<compile_context>
chip_gen: v6e
topology: v6e:2x2x1
jax: 0.10.0
libtpu: 0.0.40
codegen_flags: <defaults>
</compile_context>

<pallas_src>
import numpy as np
import jax
import jax.numpy as jnp
from jax.experimental import pallas as pl
from jax.experimental.pallas import tpu as pltpu

_EPS = 1e-7
_INV_TEMP = 10.0  # 1 / temp, temp = 0.1


def _cd_linear_kernel(consts_ref, x_ref, u_ref, w_ref, b_ref, o_ref):
    # Scalars (SMEM): c = (log(p+eps)-log(1-p+eps))/temp ; inv_retain = 1/(1-p)
    c = consts_ref[0]
    inv_retain = consts_ref[1]

    # Concrete-dropout retain factor.  sigmoid(-z) == 1 - sigmoid(z), so
    # retain == 1 - drop_prob.  One log (of the ratio) instead of two.
    u = u_ref[...]
    logits = c + jnp.log((u + _EPS) / (1.0 - u + _EPS)) * _INV_TEMP
    retain = jax.nn.sigmoid(-logits)

    # Dropped activations, cast to bf16 for full-rate MXU (f32 accumulate).
    xd = (x_ref[...] * (retain * inv_retain)).astype(jnp.bfloat16)

    # Wrapped Linear layer: full-width MXU matmul + bias (W, b fully resident).
    acc = jnp.dot(xd, w_ref[...], preferred_element_type=jnp.float32)
    o_ref[...] = (acc + b_ref[...]).astype(o_ref.dtype)


def concrete_dropout_linear(x, unif_noise, p_logit, weight, bias, *, tm=256):
    """x, unif_noise: [B, F_in] f32; weight: [F_in, F_out]; bias: [1, F_out];
    p_logit: [1] f32."""
    B, F_in = x.shape
    F_out = weight.shape[1]

    tm = min(tm, B)
    # Keep >= 2 row blocks when possible so v7x can shard the 'parallel' batch
    # axis across its two TensorCores (harmless on v5e/v6e single-TC chips).
    if B // tm < 2 and tm % 2 == 0 and tm >= 16 and B % (tm // 2) == 0:
        tm //= 2
    assert B % tm == 0, "batch must tile evenly"

    # Scalar, p-derived constants (O(1) work) -> SMEM.
    p = jax.nn.sigmoid(p_logit.reshape(())).astype(jnp.float32)
    c = (jnp.log(p + _EPS) - jnp.log(1.0 - p + _EPS)) * _INV_TEMP
    inv_retain = 1.0 / (1.0 - p)
    consts = jnp.stack([c, inv_retain]).astype(jnp.float32)          # (2,)

    w_bf16 = weight.astype(jnp.bfloat16)                             # half W DMA bytes

    grid = (B // tm,)

    # VMEM estimate (double-buffered tiles + resident W/bias) with headroom;
    # v5e's scoped default is only 16 MiB, so be explicit.
    est_vmem = (2 * tm * F_in * 4          # x tiles
                + 2 * tm * F_in * 4        # noise tiles
                + 2 * F_in * F_out * 2     # W (bf16), conservatively x2
                + 2 * F_out * 4            # bias
                + 2 * tm * F_out * 4)      # output tiles
    vmem_limit = int(min(max(2 * est_vmem, 16 * 1024 * 1024), 48 * 1024 * 1024))

    cost = pl.CostEstimate(
        flops=2 * B * F_in * F_out,
        transcendentals=3 * B * F_in,  # log + exp + recip (sigmoid) per element
        bytes_accessed=4 * (2 * B * F_in + F_out + B * F_out) + 2 * F_in * F_out,
    )

    return pl.pallas_call(
        _cd_linear_kernel,
        out_shape=jax.ShapeDtypeStruct((B, F_out), jnp.float32),
        grid=grid,
        in_specs=[
            pl.BlockSpec(memory_space=pltpu.MemorySpace.SMEM),        # consts (2,) f32
            pl.BlockSpec((tm, F_in), lambda i: (i, 0)),               # x row block
            pl.BlockSpec((tm, F_in), lambda i: (i, 0)),               # noise row block
            pl.BlockSpec((F_in, F_out), lambda i: (0, 0)),            # W (resident)
            pl.BlockSpec((1, F_out), lambda i: (0, 0)),               # bias (resident)
        ],
        out_specs=pl.BlockSpec((tm, F_out), lambda i: (i, 0)),
        compiler_params=pltpu.CompilerParams(
            dimension_semantics=("parallel",),
            vmem_limit_bytes=vmem_limit,
        ),
        cost_estimate=cost,
    )(consts, x, unif_noise, w_bf16, bias)


def reference(x, unif_noise, p_logit, weight, bias):
    """Pure-JAX mirror of the PyTorch module's forward (given the same noise).
    Matmul operands are cast to bf16 (f32 accumulate) to mirror the kernel's
    MXU feeding; the dropout math itself is f32."""
    eps = 1e-7
    temp = 0.1
    p = jax.nn.sigmoid(p_logit.reshape(()))
    drop_prob = jax.nn.sigmoid(
        (jnp.log(p + eps) - jnp.log(1.0 - p + eps)
         + jnp.log(unif_noise + eps) - jnp.log(1.0 - unif_noise + eps)) / temp)
    x_drop = x * (1.0 - drop_prob) / (1.0 - p)
    out = jnp.dot(x_drop.astype(jnp.bfloat16), weight.astype(jnp.bfloat16),
                  preferred_element_type=jnp.float32)
    return out + bias


if __name__ == "__main__":
    key = jax.random.PRNGKey(0)
    k_x, k_w, k_b, k_u = jax.random.split(key, 4)

    # Small but lane-dense / MXU-friendly shapes (multiples of 128).
    B, F_in, F_out = 256, 512, 256

    # p_logit init: uniform(init_min_logit, init_max_logit) with min == max == 0.1
    # -> the constant log(0.1) - log(0.9).
    init_p = 0.1
    p_logit = jnp.full((1,), float(np.log(init_p) - np.log(1.0 - init_p)),
                       dtype=jnp.float32)

    # Wrapped Linear layer parameters (synthetic, deterministic).
    weight = (jax.random.normal(k_w, (F_in, F_out), dtype=jnp.float32)
              / np.sqrt(F_in)).astype(jnp.float32)
    bias = (jax.random.normal(k_b, (1, F_out), dtype=jnp.float32) * 0.01
            ).astype(jnp.float32)
    x = jax.random.normal(k_x, (B, F_in), dtype=jnp.float32)

    # Uniform noise (stands in for torch's np.random.uniform; deterministic here).
    unif_noise = jax.random.uniform(k_u, (B, F_in), dtype=jnp.float32)

    out = concrete_dropout_linear(x, unif_noise, p_logit, weight, bias)
    out = jax.block_until_ready(out)

    ref = reference(x, unif_noise, p_logit, weight, bias)
    # Loosened tolerance due to bf16 MXU operands (f32 accumulate).
    np.testing.assert_allclose(np.asarray(out), np.asarray(ref),
                               rtol=2e-2, atol=2e-2)

    print("KERNEL_OK")
</pallas_src>

<mosaic_0001>
module attributes {stable_mosaic.version = 11 : i64} {
  func.func @_cd_linear_kernel(%arg0: i32, %arg1: memref<2xf32, #tpu.memory_space<smem>>, %arg2: memref<128x512xf32, #tpu.memory_space<vmem>>, %arg3: memref<128x512xf32, #tpu.memory_space<vmem>>, %arg4: memref<512x256xbf16, #tpu.memory_space<vmem>>, %arg5: memref<1x256xf32, #tpu.memory_space<vmem>>, %arg6: memref<128x256xf32, #tpu.memory_space<vmem>>) attributes {dimension_semantics = [#tpu.dimension_semantics<parallel>], iteration_bounds = array<i64: 2>, scalar_prefetch = 0 : i64, scratch_operands = 0 : i64, tpu.core_type = #tpu.core_type<tc>, window_params = [{transform_indices = @transform_0, window_bounds = array<i64: 2>}, {transform_indices = @transform_1, window_bounds = array<i64: 128, 512>}, {transform_indices = @transform_2, window_bounds = array<i64: 128, 512>}, {pipeline_mode = #tpu.pipeline_mode<synchronous>, transform_indices = @transform_3, window_bounds = array<i64: 512, 256>}, {pipeline_mode = #tpu.pipeline_mode<synchronous>, transform_indices = @transform_4, window_bounds = array<i64: 1, 256>}, {transform_indices = @transform_5, window_bounds = array<i64: 128, 256>}]} {
    %c0 = arith.constant 0 : index
    %0 = memref.load %arg1[%c0] : memref<2xf32, #tpu.memory_space<smem>>
    %c1 = arith.constant 1 : index
    %1 = memref.load %arg1[%c1] : memref<2xf32, #tpu.memory_space<smem>>
    %c0_0 = arith.constant 0 : index
    %c0_1 = arith.constant 0 : index
    %2 = vector.load %arg3[%c0_0, %c0_1] : memref<128x512xf32, #tpu.memory_space<vmem>>, vector<128x512xf32>
    %cst = arith.constant 1.000000e-07 : f32
    %3 = vector.broadcast %cst : f32 to vector<128x512xf32>
    %4 = arith.addf %2, %3 : vector<128x512xf32>
    %cst_2 = arith.constant 1.000000e+00 : f32
    %5 = vector.broadcast %cst_2 : f32 to vector<128x512xf32>
    %6 = arith.subf %5, %2 : vector<128x512xf32>
    %cst_3 = arith.constant 1.000000e-07 : f32
    %7 = vector.broadcast %cst_3 : f32 to vector<128x512xf32>
    %8 = arith.addf %6, %7 : vector<128x512xf32>
    %9 = arith.divf %4, %8 : vector<128x512xf32>
    %10 = math.log %9 : vector<128x512xf32>
    %cst_4 = arith.constant 1.000000e+01 : f32
    %11 = vector.broadcast %cst_4 : f32 to vector<128x512xf32>
    %12 = arith.mulf %10, %11 : vector<128x512xf32>
    %13 = vector.broadcast %0 : f32 to vector<128x512xf32>
    %14 = arith.addf %13, %12 : vector<128x512xf32>
    %cst_5 = arith.constant 0.000000e+00 : f32
    %15 = vector.broadcast %cst_5 : f32 to vector<128x512xf32>
    %16 = arith.subf %15, %14 : vector<128x512xf32>
    %17 = arith.negf %16 : vector<128x512xf32>
    %18 = math.exp %17 : vector<128x512xf32>
    %cst_6 = arith.constant 1.000000e+00 : f32
    %19 = vector.broadcast %cst_6 : f32 to vector<128x512xf32>
    %20 = arith.addf %19, %18 : vector<128x512xf32>
    %21 = arith.divf %19, %20 : vector<128x512xf32>
    %c0_7 = arith.constant 0 : index
    %c0_8 = arith.constant 0 : index
    %22 = vector.load %arg2[%c0_7, %c0_8] : memref<128x512xf32, #tpu.memory_space<vmem>>, vector<128x512xf32>
    %23 = vector.broadcast %1 : f32 to vector<128x512xf32>
    %24 = arith.mulf %21, %23 : vector<128x512xf32>
    %25 = arith.mulf %22, %24 : vector<128x512xf32>
    %26 = arith.truncf %25 : vector<128x512xf32> to vector<128x512xbf16>
    %c0_9 = arith.constant 0 : index
    %c0_10 = arith.constant 0 : index
    %27 = vector.load %arg4[%c0_9, %c0_10] : memref<512x256xbf16, #tpu.memory_space<vmem>>, vector<512x256xbf16>
    %cst_11 = arith.constant dense<0.000000e+00> : vector<128x256xf32>
    %28 = tpu.matmul %26, %27, %cst_11 {dimension_numbers = #tpu.dot_dimension_numbers<[1], [0], [0], [1], [0, 0, 1, 1], [], []>} : vector<128x512xbf16>, vector<512x256xbf16>, vector<128x256xf32> -> vector<128x256xf32>
    %c0_12 = arith.constant 0 : index
    %c0_13 = arith.constant 0 : index
    %29 = vector.load %arg5[%c0_12, %c0_13] : memref<1x256xf32, #tpu.memory_space<vmem>>, vector<1x256xf32>
    %30 = vector.broadcast %29 : vector<1x256xf32> to vector<128x256xf32>
    %31 = arith.addf %28, %30 : vector<128x256xf32>
    %c0_14 = arith.constant 0 : index
    %c0_15 = arith.constant 0 : index
    %32 = vector.load %arg6[%c0_14, %c0_15] : memref<128x256xf32, #tpu.memory_space<vmem>>, vector<128x256xf32>
    tpu.vector_store %arg6[%c0_14, %c0_15], %31 {strides = array<i32>} : memref<128x256xf32, #tpu.memory_space<vmem>>, vector<128x256xf32>,
    return
  }
  func.func @transform_0(%arg0: i32) -> i32 {
    %c0_i32 = arith.constant 0 : i32
    %c0_i32_0 = arith.constant 0 : i32
    return %c0_i32 : i32
  }
  func.func @transform_1(%arg0: i32) -> (i32, i32) {
    %c0_i32 = arith.constant 0 : i32
    %c0_i32_0 = arith.constant 0 : i32
    return %arg0, %c0_i32 : i32, i32
  }
  func.func @transform_2(%arg0: i32) -> (i32, i32) {
    %c0_i32 = arith.constant 0 : i32
    %c0_i32_0 = arith.constant 0 : i32
    return %arg0, %c0_i32 : i32, i32
  }
  func.func @transform_3(%arg0: i32) -> (i32, i32) {
    %c0_i32 = arith.constant 0 : i32
    %c0_i32_0 = arith.constant 0 : i32
    %c0_i32_1 = arith.constant 0 : i32
    return %c0_i32, %c0_i32_0 : i32, i32
  }
  func.func @transform_4(%arg0: i32) -> (i32, i32) {
    %c0_i32 = arith.constant 0 : i32
    %c0_i32_0 = arith.constant 0 : i32
    %c0_i32_1 = arith.constant 0 : i32
    return %c0_i32, %c0_i32_0 : i32, i32
  }
  func.func @transform_5(%arg0: i32) -> (i32, i32) {
    %c0_i32 = arith.constant 0 : i32
    %c0_i32_0 = arith.constant 0 : i32
    return %arg0, %c0_i32 : i32, i32
  }
}

</mosaic_0001>

<bundles_post_ra>
// kernel: tpu_custom_call.1
= control target key start
LH: loop header
LB: loop body
LE: loop exit
PB: predicated region body
PF: predicated region fallthrough
CT: control target
= control target key end

     0   :  { %s4322_s0 = inlined_call_operand.hbm [shape: f32[2], index: 0, kind: input, shape index: {}]   ;;  %s4323_s1 = inlined_call_operand.hbm [shape: f32[256,512], index: 1, kind: input, shape index: {}]   ;;  %s4324_s2 = inlined_call_operand.hbm [shape: f32[256,512], index: 2, kind: input, shape index: {}]   ;;  %s4325_s3 = inlined_call_operand.hbm [shape: bf16[512,256], index: 3, kind: input, shape index: {}]   ;;  %s4326_s4 = inlined_call_operand.vmem [shape: f32[1,256], index: 4, kind: input, shape index: {}]   ;;  %s4327_s5 = inlined_call_operand.hbm [shape: f32[256,256], index: 5, kind: output, shape index: {}]  }
   0x1   :  { %4331 = sst [smem:[#allocation16_spill]] %s4322_s0 }
   0x2   :  { %4332 = sst [smem:[#allocation17_spill]] %s4323_s1 }
   0x3   :  { %10 = vsyncpa [#allocation5], 0 }
   0x4   :  { %11 = vsyncpa [#allocation3], 0 }
   0x5   :  { %13 = vsyncpa [#allocation3 + $0x1], 0 }
   0x6   :  { %14 = vsyncpa [#allocation8], 0 }
   0x7   :  { %16 = vsyncpa [#allocation8 + $0x1], 0 }
   0x8   :  { %17 = vsyncpa [#allocation4], 0 }
   0x9   :  { %19 = vsyncpa [#allocation4 + $0x1], 0  ;;  %s3474_s18 = smov 0   ;;  %s3476_s19 = smov 0  }
   0xa   :  { %s3478_s20 = smov 0   ;;  %s3480_s21 = smov 0  }
   0xb LB: > { %s3495_s22 = sadd.s32 4294967295, %s3431_s21   ;;  %s2416_s23 = sadd.s32 4294967294, %s3431_s21   ;;  %s3431_s21 = sphi %s3480_s21, %s4353_s21   ;;  %s3427_s20 = sphi %s3478_s20, %s4352_s20   ;;  %s3423_s19 = sphi %s3476_s19, %s4351_s19   ;;  %s3419_s18 = sphi %s3474_s18, %s4350_s18  }
   0xc   : > { %p66_p0 = scmp.ne.s32.totalorder %s3423_s19, %s3419_s18  ;;  %p4328_p1 = scmp.eq.s32.totalorder %s3495_s22, 0 }
   0xd   : > { %p164_p3 = scmp.eq.s32.totalorder %s2416_s23, 1  ;;  %p2417_p5 = scmp.ge.s32.totalorder %s3431_s21, 1 }
   0xe   : > { %p3504_p4 = por %p4328_p1, %p66_p0  ;;  %p171_p7 = scmp.lt.s32.totalorder %s3431_s21, 3 }
   0xf   : > { %p3509_p6 = por %p164_p3, %p66_p0  ;;  %s3433_s27 = smov [#allocation9]  }
  0x10   : > { %s4333_s24 = scalar_select %p3504_p4, 1, 0 }
  0x11   : > { %s4334_s25 = scalar_select %p3509_p6, 1, 0 }
  0x12   : > { %p3514_p8 = pnand %p2417_p5, %p171_p7  ;;  %s192_s28 = sshll.u32 %s3433_s27, 4  ;;  %s193_s28 = int_to_ptr.vmem [resolvable:$true] %s192_s28 }
  0x13   : > { %s3528_s30 = sadd.s32 1, %s3431_s21   ;;  %s3273_s7 = scalar_lea.vmem %s193_s28, 8192 }
  0x14   : > { %p2590_p9 = pneg %p3514_p8  ;;  %s50_s6 = ssub.s32 %s3431_s21, %s3528_s30 }
  0x15   : > { %p3274_p13 = scmp.ne.s32.totalorder %s193_s28, %s3273_s7  ;;  %p3281_p5 = scmp.lt.s32.totalorder %s193_s28, %s193_s28 }
  0x16   : > { %p3523_p11 = pnand %p2590_p9, %p4328_p1  ;;  %p3282_p7 = scmp.lt.s32.totalorder %s3273_s7, %s3273_s7 }
  0x18   : > { %p3264_p12 = pneg %p3523_p11  ;;  %p3283_p2 = por %p3282_p7, %p3281_p5 }
  0x1a   : > { %p3276_p0 = pnand %p3274_p13, %p3264_p12 }
  0x1c   : > { %p3277_p3 = pneg %p3276_p0 }
  0x1e   : > { %p3284_p10 = pnand %p3283_p2, %p3277_p3 }
  0x20   : > { %3287 = shalt.err (!%p3284_p10)
}
  0x21   : > { %s3434_s8 = smov 128   ;;  %s3435_s9 = smov 8  }
  0x22   : > { %2596 = dma.hbm_to_vmem [thread:$0]  (!%p3523_p11), %s4325_s3, 8192, %s193_s28, [#allocation8], %s3434_s8, %s3434_s8, %s3435_s9  }
  0x23   : > { %s3436_s12 = smov [#allocation2]   ;;  %s4337_s0 = sld [smem:[#allocation16_spill]] }
  0x24   : > { %p51_p2 = scmp.eq.s32.totalorder %s50_s6, 0  ;;  %s53_s15 = sadd.s32 1, %s3427_s20 }
  0x25   : > { %p60_p9 = scmp.ne.s32.totalorder %s3427_s20, %s3423_s19  ;;  %p61_p10 = scmp.eq.s32.totalorder %s3431_s21, 0 }
  0x26   : > { %s3549_s16 = scalar_select %p51_p2, %s3427_s20, %s53_s15  }
  0x27   : > { %p62_p12 = por %p61_p10, %p60_p9  ;;  %p4338_p13 = scmp.eq.s32.totalorder %s3495_s22, 1 }
  0x28   : > { %p2610_p3 = scmp.lt.s32.totalorder %s3431_s21, 2  ;;  %s209_s23 = sand.u32 1, %s3427_s20  }
  0x29   : > { %2593 = dma.hbm_to_smem (!%p3523_p11), %s4337_s0, 16, %s3436_s12, [#allocation5]  }
  0x2a   : > { %p3553_p0 = por %p4338_p13, %p60_p9  ;;  %s3559_s27 = sshll.u32 %s209_s23, 9 }
  0x2b   : > { %s2571_s28 = sshll.u32 %s3431_s21, 13  ;;  %s4340_s1 = sld [smem:[#allocation17_spill]] }
  0x2c   : > { %s4339_s17 = scalar_select %p3553_p0, 1, 0 }
  0x2d   : > { %s213_s8 = scalar_lea.vmem [#allocation6], %s3559_s27  ;;  %p3572_p11 = pnand %p2610_p3, %p62_p12 }
  0x2e   : > { %s221_s9 = sshll.u32 %s213_s8, 4  ;;  %s3576_s11 = scalar_lea.sflag [#allocation3], %s209_s23  ;;  %s3570_s9 = int_to_ptr.vmem [resolvable:$true] %s221_s9 }
  0x2f   : > { %p3301_p7 = pneg %p3572_p11 }
  0x31   : > { %s3567_s7 = scalar_lea.hbm %s4340_s1, %s2571_s28  ;;  %s3304_s15 = scalar_lea.hbm %s4340_s1, 16384 }
  0x32   : > { %s3299_s12 = scalar_lea.hbm %s3567_s7, 8192  ;;  %p3305_p10 = scmp.lt.s32.totalorder %s3567_s7, %s4340_s1 }
  0x33   : > { %p3300_p5 = scmp.ne.s32.totalorder %s3567_s7, %s3299_s12  ;;  %p3306_p12 = scmp.lt.s32.totalorder %s3304_s15, %s3299_s12 }
  0x35   : > { %p3302_p2 = pnand %p3301_p7, %p3300_p5  ;;  %p3307_p13 = por %p3306_p12, %p3305_p10 }
  0x37   : > { %p3303_p9 = pneg %p3302_p2 }
  0x39   : > { %p3308_p3 = pnand %p3307_p13, %p3303_p9 }
  0x3b   : > { %3311 = shalt.err (!%p3308_p3)
}
  0x3c   : > { %s3312_s23 = scalar_lea.vmem %s3570_s9, 8192  ;;  %s3437_s8 = smov [#allocation6]  }
  0x3d   : > { %p3313_p1 = scmp.ne.s32.totalorder %s3570_s9, %s3312_s23  ;;  %s3317_s13 = sshll.u32 %s3437_s8, 4  ;;  %s3318_s13 = int_to_ptr.vmem [resolvable:$false] %s3317_s13 }
  0x3e   : > { %s3319_s14 = scalar_lea.vmem %s3318_s13, 16384  ;;  %p3320_p6 = scmp.lt.s32.totalorder %s3570_s9, %s3318_s13 }
  0x3f   : > { %p3315_p5 = pnand %p3313_p1, %p3301_p7  ;;  %p3321_p0 = scmp.lt.s32.totalorder %s3319_s14, %s3312_s23 }
  0x41   : > { %p3316_p2 = pneg %p3315_p5  ;;  %p3322_p4 = por %p3321_p0, %p3320_p6 }
  0x43   : > { %p3323_p10 = pnand %p3322_p4, %p3316_p2 }
  0x45   : > { %3326 = shalt.err (!%p3323_p10)
}
  0x46   : > { %s3438_s12 = smov 512   ;;  %s3439_s15 = smov 32  }
  0x47   : > { %2600 = dma.hbm_to_vmem [thread:$0]  (!%p3572_p11), %s3567_s7, 8192, %s3570_s9, %s3576_s11, %s3438_s12, %s3438_s12, %s3439_s15  }
  0x48   : > { %s3611_s23 = scalar_lea.hbm %s4324_s2, %s2571_s28  ;;  %s235_s8 = scalar_lea.vmem [#allocation7], %s3559_s27 }
  0x49   : > { %s243_s13 = sshll.u32 %s235_s8, 4  ;;  %s231_s14 = sand.u32 1, %s3431_s21   ;;  %s3614_s13 = int_to_ptr.vmem [resolvable:$true] %s243_s13 }
  0x4a   : > { %s232_s0 = scalar_lea.sflag [#allocation8], %s231_s14  ;;  %s3327_s1 = scalar_lea.hbm %s3611_s23, 8192 }
  0x4b   : > { %p3328_p1 = scmp.ne.s32.totalorder %s3611_s23, %s3327_s1  ;;  %s3332_s28 = scalar_lea.hbm %s4324_s2, 16384 }
  0x4c   : > { %p3333_p0 = scmp.lt.s32.totalorder %s3611_s23, %s4324_s2  ;;  %p3334_p9 = scmp.lt.s32.totalorder %s3332_s28, %s3327_s1 }
  0x4d   : > { %p3330_p4 = pnand %p3328_p1, %p3301_p7 }
  0x4e   : > { %p3335_p12 = por %p3334_p9, %p3333_p0 }
  0x4f   : > { %p3331_p6 = pneg %p3330_p4 }
  0x51   : > { %p3336_p13 = pnand %p3335_p12, %p3331_p6 }
  0x53   : > { %3339 = shalt.err (!%p3336_p13)
}
  0x54   : > { %s3340_s27 = scalar_lea.vmem %s3614_s13, 8192  ;;  %s3440_s6 = smov [#allocation7]  }
  0x55   : > { %p3341_p3 = scmp.ne.s32.totalorder %s3614_s13, %s3340_s27  ;;  %s3345_s8 = sshll.u32 %s3440_s6, 4  ;;  %s3346_s8 = int_to_ptr.vmem [resolvable:$false] %s3345_s8 }
  0x56   : > { %s3347_s14 = scalar_lea.vmem %s3346_s8, 16384  ;;  %p3348_p10 = scmp.lt.s32.totalorder %s3614_s13, %s3346_s8 }
  0x57   : > { %p3343_p5 = pnand %p3341_p3, %p3301_p7  ;;  %p3349_p1 = scmp.lt.s32.totalorder %s3347_s14, %s3340_s27 }
  0x59   : > { %p3344_p2 = pneg %p3343_p5  ;;  %p3350_p4 = por %p3349_p1, %p3348_p10 }
  0x5b   : > { %p3351_p0 = pnand %p3350_p4, %p3344_p2 }
  0x5d   : > { %3354 = shalt.err (!%p3351_p0)
}
  0x5e   : > { %2603 = dma.hbm_to_vmem [thread:$0]  (!%p3572_p11), %s3611_s23, 8192, %s3614_s13, %s232_s0, %s3438_s12, %s3438_s12, %s3439_s15  }
  0x5f   : > { %255 = sbr.rel (%p3514_p8) target bundleno = 699 (0x2bb), region = 40  ;;  %p4342_p7 = scmp.eq.s32.totalorder (!%p3514_p8), %s3495_s22, 0 }
  0x64   : > { %3398 = dma.done.wait (%p4342_p7), [#allocation5], 16   ;;  %p4343_p6 = pmov %p4342_p7 }
  0x65   : > { %s3649_s1 = sand.u32 1, %s3423_s19   ;;  %p4344_p11 = scmp.ne.s32.totalorder %s4333_s24, 0 }
  0x66   : > { %3400 = vsyncadd (%p4343_p6), [#allocation5], 4294967280  ;;  %s2431_s10 = sshll.u32 %s3649_s1, 9  ;;  %s262_s7 = scalar_lea.sflag [#allocation3], %s3649_s1 }
  0x67   : > { %s3653_s9 = scalar_lea.vmem [#allocation6], %s2431_s10 }
  0x68   : > { %3402 = dma.done.wait (%p4344_p11), %s262_s7, 8192  }
  0x69   : > { %3404 = vsyncadd (%p4344_p11), %s262_s7, 4294959104  ;;  %s270_s0 = sand.u32 1, %s3495_s22   ;;  %s3660_s12 = scalar_lea.vmem [#allocation7], %s2431_s10 }
  0x6a   : > { %s271_s26 = scalar_lea.sflag [#allocation8], %s270_s0 }
  0x6b   : > { %3406 = dma.done.wait (%p4344_p11), %s271_s26, 8192  }
  0x6c   : > { %3408 = vsyncadd (%p4344_p11), %s271_s26, 4294959104  ;;  %p4345_p8 = pmov %p4343_p6 }
  0x6d   : > { %p4346_p9 = pmov %p4343_p6 }
  0x6e   : > { %3410 = dma.done.wait (%p4345_p8), [#allocation8], 8192  }
  0x6f   : > { %3412 = vsyncadd (%p4346_p9), [#allocation8], 4294959104 }
  0x70   : > { %283 = sfence }
  0x71   : > { %v2654_v0 = vld [vmem:[#allocation9 + $0x74] ss:$8 sps:$4 sm:$0xff]   ;;  %v2658_v2 = vld [vmem:[#allocation9 + $0x70] ss:$8 sps:$4 sm:$0xff]   ;;  %v2660_v4 = vld [vmem:[#allocation9 + $0x64] ss:$8 sps:$4 sm:$0xff]  }
  0x72   : > { %v2656_v1 = vld [vmem:[#allocation9 + $0x174] ss:$8 sps:$4 sm:$0xff]   ;;  %2026 = vmatprep.subr.bf16.mxu0 %v2654_v0  ;;  %v2659_v3 = vld [vmem:[#allocation9 + $0x170] ss:$8 sps:$4 sm:$0xff]   ;;  %v2662_v5 = vld [vmem:[#allocation9 + $0x164] ss:$8 sps:$4 sm:$0xff]  }
  0x73   : > { %2139 = vmatprep.subr.bf16.mxu1 %v2656_v1  ;;  %2027 = vmatpush1.bf16.msra.mxu0 %v2658_v2  ;;  %v2664_v6 = vld [vmem:[#allocation9 + $0x60] ss:$8 sps:$4 sm:$0xff]   ;;  %v2666_v8 = vld [vmem:[#allocation9 + $0x54] ss:$8 sps:$4 sm:$0xff]   ;;  %v2670_v10 = vld [vmem:[#allocation9 + $0x50] ss:$8 sps:$4 sm:$0xff]  }
  0x74   : > { %2140 = vmatpush1.bf16.msra.mxu1 %v2659_v3  ;;  %2028 = vmatprep.subr.bf16.mxu0 %v2660_v4  ;;  %v2665_v7 = vld [vmem:[#allocation9 + $0x160] ss:$8 sps:$4 sm:$0xff]   ;;  %v2668_v9 = vld [vmem:[#allocation9 + $0x154] ss:$8 sps:$4 sm:$0xff]   ;;  %v2671_v11 = vld [vmem:[#allocation9 + $0x150] ss:$8 sps:$4 sm:$0xff]  }
  0x75   : > { %2141 = vmatprep.subr.bf16.mxu1 %v2662_v5  ;;  %v2672_v12 = vld [vmem:[#allocation9 + $0x44] ss:$8 sps:$4 sm:$0xff]   ;;  %v2676_v14 = vld [vmem:[#allocation9 + $0x40] ss:$8 sps:$4 sm:$0xff]   ;;  %v2678_v16 = vld [vmem:[#allocation9 + $0x34] ss:$8 sps:$4 sm:$0xff]  }
  0x76   : > { %v2674_v13 = vld [vmem:[#allocation9 + $0x144] ss:$8 sps:$4 sm:$0xff]   ;;  %v2677_v15 = vld [vmem:[#allocation9 + $0x140] ss:$8 sps:$4 sm:$0xff]   ;;  %v2680_v17 = vld [vmem:[#allocation9 + $0x134] ss:$8 sps:$4 sm:$0xff]  }
  0x77   : > { %2029 = vmatpush1.bf16.msra.mxu0 %v2664_v6  ;;  %v2682_v18 = vld [vmem:[#allocation9 + $0x30] ss:$8 sps:$4 sm:$0xff]   ;;  %v2684_v20 = vld [vmem:[#allocation9 + $0x24] ss:$8 sps:$4 sm:$0xff]   ;;  %v2688_v22 = vld [vmem:[#allocation9 + $0x20] ss:$8 sps:$4 sm:$0xff]  }
  0x78   : > { %2142 = vmatpush1.bf16.msra.mxu1 %v2665_v7  ;;  %2030 = vmatprep.subr.bf16.mxu0 %v2666_v8  ;;  %v2683_v19 = vld [vmem:[#allocation9 + $0x130] ss:$8 sps:$4 sm:$0xff]   ;;  %v2686_v21 = vld [vmem:[#allocation9 + $0x124] ss:$8 sps:$4 sm:$0xff]   ;;  %v2689_v23 = vld [vmem:[#allocation9 + $0x120] ss:$8 sps:$4 sm:$0xff]  }
  0x79   : > { %2143 = vmatprep.subr.bf16.mxu1 %v2668_v9  ;;  %v2690_v24 = vld [vmem:[#allocation9 + $0x14] ss:$8 sps:$4 sm:$0xff]   ;;  %v2694_v26 = vld [vmem:[#allocation9 + $0x10] ss:$8 sps:$4 sm:$0xff]   ;;  %v2696_v28 = vld [vmem:[#allocation9 + $0x4] ss:$8 sps:$4 sm:$0xff]  }
  0x7a   : > { %v2692_v25 = vld [vmem:[#allocation9 + $0x114] ss:$8 sps:$4 sm:$0xff]   ;;  %v2695_v27 = vld [vmem:[#allocation9 + $0x110] ss:$8 sps:$4 sm:$0xff]   ;;  %v2698_v29 = vld [vmem:[#allocation9 + $0x104] ss:$8 sps:$4 sm:$0xff]  }
  0x7b   : > { %2031 = vmatpush1.bf16.msra.mxu0 %v2670_v10  ;;  %v2700_v30 = vld [vmem:[#allocation9] ss:$8 sps:$4 sm:$0xff]   ;;  %v2702_v32 = vld [vmem:[#allocation9 + $0xf4] ss:$8 sps:$4 sm:$0xff]   ;;  %v2706_v34 = vld [vmem:[#allocation9 + $0xf0] ss:$8 sps:$4 sm:$0xff]  }
  0x7c   : > { %2144 = vmatpush1.bf16.msra.mxu1 %v2671_v11  ;;  %2032 = vmatprep.subr.bf16.mxu0 %v2672_v12  ;;  %v2701_v31 = vld [vmem:[#allocation9 + $0x100] ss:$8 sps:$4 sm:$0xff]   ;;  %v2704_v33 = vld [vmem:[#allocation9 + $0x1f4] ss:$8 sps:$4 sm:$0xff]   ;;  %v2707_v35 = vld [vmem:[#allocation9 + $0x1f0] ss:$8 sps:$4 sm:$0xff]  }
  0x7d   : > { %2145 = vmatprep.subr.bf16.mxu1 %v2674_v13  ;;  %v2708_v36 = vld [vmem:[#allocation9 + $0xe4] ss:$8 sps:$4 sm:$0xff]   ;;  %v2712_v38 = vld [vmem:[#allocation9 + $0xe0] ss:$8 sps:$4 sm:$0xff]   ;;  %v2714_v40 = vld [vmem:[#allocation9 + $0xd4] ss:$8 sps:$4 sm:$0xff]  }
  0x7e   : > { %v2710_v37 = vld [vmem:[#allocation9 + $0x1e4] ss:$8 sps:$4 sm:$0xff]   ;;  %v2713_v39 = vld [vmem:[#allocation9 + $0x1e0] ss:$8 sps:$4 sm:$0xff]   ;;  %v2716_v41 = vld [vmem:[#allocation9 + $0x1d4] ss:$8 sps:$4 sm:$0xff]  }
  0x7f   : > { %2033 = vmatpush1.bf16.msra.mxu0 %v2676_v14  ;;  %v2718_v42 = vld [vmem:[#allocation9 + $0xd0] ss:$8 sps:$4 sm:$0xff]   ;;  %v2720_v44 = vld [vmem:[#allocation9 + $0xc4] ss:$8 sps:$4 sm:$0xff]   ;;  %v2724_v47 = vld [vmem:[#allocation9 + $0xc0] ss:$8 sps:$4 sm:$0xff]  }
  0x80   : > { %2146 = vmatpush1.bf16.msra.mxu1 %v2677_v15  ;;  %2034 = vmatprep.subr.bf16.mxu0 %v2678_v16  ;;  %v2719_v43 = vld [vmem:[#allocation9 + $0x1d0] ss:$8 sps:$4 sm:$0xff]   ;;  %v2722_v45 = vld [vmem:[#allocation9 + $0x1c4] ss:$8 sps:$4 sm:$0xff]   ;;  %v2725_v50 = vld [vmem:[#allocation9 + $0x1c0] ss:$8 sps:$4 sm:$0xff]  }
  0x81   : > { %2147 = vmatprep.subr.bf16.mxu1 %v2680_v17  ;;  %v3671_v46 = vld [vmem:[%s3660_s12 + $0x8] sm:$0xff]  ;;  %v3679_v52 = vld [vmem:[%s3660_s12 + $0x18] sm:$0xff]  ;;  %v3687_v61 = vld [vmem:[%s3660_s12] sm:$0xff]  ;;  %s3748_s24 = sld [smem:[#allocation2]]  ;;  %s2434_s28 = sshll.u32 %s3649_s1, 8 }
  0x82   : > { %v3674_v48 = vld [vmem:[%s3660_s12 + $0x28] sm:$0xff]  ;;  %v445_v49 = vsub.f32 1.0, %v3671_v46  ;;  %v3682_v53 = vld [vmem:[%s3660_s12 + $0x38] sm:$0xff]  ;;  %v447_v59 = vsub.f32 1.0, %v3679_v52  ;;  %v3690_v0 = vld [vmem:[%s3660_s12 + $0x20] sm:$0xff]  ;;  %v444_v1 = vsub.f32 1.0, %v3687_v61 }
  0x83   : > { %2035 = vmatpush1.bf16.msra.mxu0 %v2682_v18  ;;  %v449_v51 = vsub.f32 1.0, %v3674_v48  ;;  %v2726_v54 = vld [vmem:[#allocation9 + $0xb4] ss:$8 sps:$4 sm:$0xff]   ;;  %v2730_v57 = vld [vmem:[#allocation9 + $0xb0] ss:$8 sps:$4 sm:$0xff]   ;;  %v451_v60 = vsub.f32 1.0, %v3682_v53 }
  0x84   : > { %2148 = vmatpush1.bf16.msra.mxu1 %v2683_v19  ;;  %2036 = vmatprep.subr.bf16.mxu0 %v2684_v20  ;;  %v2728_v55 = vld [vmem:[#allocation9 + $0x1b4] ss:$8 sps:$4 sm:$0xff]   ;;  %v509_v56 = vadd.f32 1e-07, %v445_v49  ;;  %v2731_v62 = vld [vmem:[#allocation9 + $0x1b0] ss:$8 sps:$4 sm:$0xff]  }
  0x85   : > { %2149 = vmatprep.subr.bf16.mxu1 %v2686_v21  ;;  %v513_v58 = vadd.f32 1e-07, %v449_v51  ;;  %v2732_v63 = vld [vmem:[#allocation9 + $0xa4] ss:$8 sps:$4 sm:$0xff]   ;;  %v511_v3 = vadd.f32 1e-07, %v447_v59 }
  0x86   : > { %2750 = vrcp.f32 %v509_v56  ;;  %v2734_v2 = vld [vmem:[#allocation9 + $0x1a4] ss:$8 sps:$4 sm:$0xff]   ;;  %v515_v4 = vadd.f32 1e-07, %v451_v60  ;;  %v448_v5 = vsub.f32 1.0, %v3690_v0  ;;  %v3695_v7 = vld [vmem:[%s3660_s12 + $0x10] sm:$0xff] }
  0x87   : > { %2037 = vmatpush1.bf16.msra.mxu0 %v2688_v22  ;;  %2752 = vrcp.f32 %v513_v58  ;;  %v508_v6 = vadd.f32 1e-07, %v444_v1  ;;  %v3698_v8 = vld [vmem:[%s3660_s12 + $0x30] sm:$0xff]  ;;  %v2736_v9 = vld [vmem:[#allocation9 + $0xa0] ss:$8 sps:$4 sm:$0xff]   ;;  %v446_v11 = vsub.f32 1.0, %v3695_v7 }
  0x88   : > { %2150 = vmatpush1.bf16.msra.mxu1 %v2689_v23  ;;  %2038 = vmatprep.subr.bf16.mxu0 %v2690_v24  ;;  %v2737_v10 = vld [vmem:[#allocation9 + $0x1a0] ss:$8 sps:$4 sm:$0xff]   ;;  %2754 = vrcp.f32 %v511_v3  ;;  %v512_v12 = vadd.f32 1e-07, %v448_v5  ;;  %v450_v13 = vsub.f32 1.0, %v3698_v8  ;;  %v3711_v22 = vld [vmem:[%s3660_s12 + $0x58] sm:$0xff] }
  0x89   : > { %2151 = vmatprep.subr.bf16.mxu1 %v2692_v25  ;;  %2756 = vrcp.f32 %v515_v4  ;;  %v3703_v14 = vld [vmem:[%s3660_s12 + $0x48] sm:$0xff]  ;;  %v2738_v16 = vld [vmem:[#allocation9 + $0x94] ss:$8 sps:$4 sm:$0xff]   ;;  %v510_v18 = vadd.f32 1e-07, %v446_v11  ;;  %s3797_s15 = sld [smem:[#allocation2 + $0x1]] }
  0x8a   : > { %v3706_v15 = vld [vmem:[%s3660_s12 + $0x68] sm:$0xff]  ;;  %v2740_v17 = vld [vmem:[#allocation9 + $0x194] ss:$8 sps:$4 sm:$0xff]   ;;  %2758 = vrcp.f32 %v508_v6  ;;  %v514_v19 = vadd.f32 1e-07, %v450_v13  ;;  %v453_v20 = vsub.f32 1.0, %v3703_v14 }
  0x8b   : > { %2039 = vmatpush1.bf16.msra.mxu0 %v2694_v26  ;;  %2760 = vrcp.f32 %v512_v12  ;;  %v457_v21 = vsub.f32 1.0, %v3706_v15  ;;  %v2742_v23 = vld [vmem:[#allocation9 + $0x90] ss:$8 sps:$4 sm:$0xff]   ;;  %v455_v26 = vsub.f32 1.0, %v3711_v22  ;;  %v382_v59 = vadd.f32 1e-07, %v3695_v7 }
  0x8c   : > { %2152 = vmatpush1.bf16.msra.mxu1 %v2695_v27  ;;  %2040 = vmatprep.subr.bf16.mxu0 %v2696_v28  ;;  %v2743_v24 = vld [vmem:[#allocation9 + $0x190] ss:$8 sps:$4 sm:$0xff]   ;;  %2762 = vrcp.f32 %v510_v18  ;;  %v2744_v27 = vld [vmem:[#allocation9 + $0x84] ss:$8 sps:$4 sm:$0xff]   ;;  %v517_v28 = vadd.f32 1e-07, %v453_v20 }
  0x8d   : > { %2153 = vmatprep.subr.bf16.mxu1 %v2698_v29  ;;  %v3714_v25 = vld [vmem:[%s3660_s12 + $0x78] sm:$0xff]  ;;  %2764 = vrcp.f32 %v514_v19  ;;  %v521_v29 = vadd.f32 1e-07, %v457_v21  ;;  %v3738_v60 = vld [vmem:[%s3660_s12 + $0x70] sm:$0xff]  ;;  %v389_v3 = vadd.f32 1e-07, %v3703_v14 }
  0x8e   : > { %2766 = vrcp.f32 %v517_v28  ;;  %v458_v4 = vsub.f32 1.0, %v3738_v60  ;;  %v393_v7 = vadd.f32 1e-07, %v3706_v15  ;;  %v395_v12 = vadd.f32 1e-07, %v3714_v25  ;;  %v3762_v28 = vld [vmem:[%s3660_s12 + $0xb8] sm:$0xff] }
  0x8f   : > { %2041 = vmatpush1.bf16.msra.mxu0 %v2700_v30  ;;  %v459_v30 = vsub.f32 1.0, %v3714_v25  ;;  %2768 = vrcp.f32 %v521_v29  ;;  %s4186_s11 = scalar_lea.vmem [#allocation10], %s2434_s28  ;;  %s2575_s29 = sshll.u32 %s3495_s22, 12 }
  0x90   : > { %2154 = vmatpush1.bf16.msra.mxu1 %v2701_v31  ;;  %2042 = vmatprep.subr.bf16.mxu0 %v2702_v32  ;;  %v519_v31 = vadd.f32 1e-07, %v455_v26  ;;  %v3719_v32 = vld [vmem:[%s3660_s12 + $0x40] sm:$0xff]  ;;  %v522_v15 = vadd.f32 1e-07, %v458_v4  ;;  %s2299_s27 = sshll.u32 %s4186_s11, 4  ;;  %s4275_s14 = scalar_lea.hbm %s4327_s5, %s2575_s29  ;;  %s4277_s27 = int_to_ptr.vmem [resolvable:$true] %s2299_s27 }
  0x91   : > { %2155 = vmatprep.subr.bf16.mxu1 %v2704_v33  ;;  %v3722_v33 = vld [vmem:[%s3660_s12 + $0x60] sm:$0xff]  ;;  %s2285_s10 = scalar_lea.sflag [#allocation4], %s3649_s1  ;;  %s3355_s22 = scalar_lea.vmem %s4277_s27, 4096 }
  0x92   : > { %2770 = vrcp.f32 %v519_v31  ;;  %v392_v20 = vadd.f32 1e-07, %v3722_v33  ;;  %p3356_p12 = scmp.ne.s32.totalorder %s4277_s27, %s3355_s22  ;;  %p4347_p13 = scmp.ne.s32.totalorder %s4339_s17, 0 }
  0x93   : > { %2043 = vmatpush2.bf16.msra.mxu0 %v2706_v34  ;;  %v2746_v34 = vld [vmem:[#allocation9 + $0x184] ss:$8 sps:$4 sm:$0xff]   ;;  %s3441_s7 = smov [#allocation10]  }
  0x94   : > { %2156 = vmatpush2.bf16.msra.mxu1 %v2707_v35  ;;  %2044 = vmatprep.subr.bf16.mxu0 %v2708_v36  ;;  %v381_v35 = vadd.f32 1e-07, %v3671_v46  ;;  %v452_v36 = vsub.f32 1.0, %v3719_v32  ;;  %p3357_p3 = pnand %p3356_p12, %p4347_p13 }
  0x95   : > { %2157 = vmatprep.subr.bf16.mxu1 %v2710_v37  ;;  %v385_v37 = vadd.f32 1e-07, %v3674_v48 }
  0x96   : > { %p3358_p5 = pneg %p3357_p3 }
  0x97   : > { %2045 = vmatpush2.bf16.msra.mxu0 %v2712_v38  ;;  %v523_v38 = vadd.f32 1e-07, %v459_v30 }
  0x98   : > { %2158 = vmatpush2.bf16.msra.mxu1 %v2713_v39  ;;  %2046 = vmatprep.subr.bf16.mxu0 %v2714_v40  ;;  %v456_v39 = vsub.f32 1.0, %v3722_v33  ;;  %v3729_v40 = vld [vmem:[%s3660_s12 + $0x50] sm:$0xff] }
  0x99   : > { %2159 = vmatprep.subr.bf16.mxu1 %v2716_v41  ;;  %v2748_v41 = vld [vmem:[#allocation9 + $0x80] ss:$8 sps:$4 sm:$0xff]   ;;  %2772 = vrcp.f32 %v523_v38  ;;  %v390_v31 = vadd.f32 1e-07, %v3729_v40  ;;  %v467_v38 = vsub.f32 1.0, %v3762_v28 }
  0x9a   : > { %v520_v46 = vadd.f32 1e-07, %v456_v39 }
  0x9b   : > { %2047 = vmatpush2.bf16.msra.mxu0 %v2718_v42  ;;  %v2749_v42 = vld [vmem:[#allocation9 + $0x180] ss:$8 sps:$4 sm:$0xff]  }
  0x9c   : > { %2160 = vmatpush2.bf16.msra.mxu1 %v2719_v43  ;;  %2048 = vmatprep.subr.bf16.mxu0 %v2720_v44  ;;  %v516_v43 = vadd.f32 1e-07, %v452_v36  ;;  %v2751_v44 = vpop.eup %2750 }
  0x9d   : > { %2161 = vmatprep.subr.bf16.mxu1 %v2722_v45  ;;  %v383_v45 = vadd.f32 1e-07, %v3679_v52  ;;  %v2753_v48 = vpop.eup %2752  ;;  %v575_v49 = vmul.f32 %v2751_v44, %v381_v35  ;;  %v384_v52 = vadd.f32 1e-07, %v3690_v0 }
  0x9e   : > { %2774 = vrcp.f32 %v516_v43  ;;  %v583_v51 = vmul.f32 %v2753_v48, %v385_v37  ;;  %v2755_v56 = vpop.eup %2754 }
  0x9f   : > { %2049 = vmatpush2.bf16.msra.mxu0 %v2724_v47  ;;  %v454_v47 = vsub.f32 1.0, %v3729_v40  ;;  %2776 = vrcp.f32 %v520_v46  ;;  %v579_v58 = vmul.f32 %v2755_v56, %v383_v45  ;;  %v3774_v56 = vadd.f32 1e-07, %v467_v38 }
  0xa0   : > { %2162 = vmatpush2.bf16.msra.mxu1 %v2725_v50  ;;  %2050 = vmatprep.subr.bf16.mxu0 %v2726_v54  ;;  %v387_v50 = vadd.f32 1e-07, %v3682_v53  ;;  %v380_v54 = vadd.f32 1e-07, %v3687_v61  ;;  %2778 = vlog2.f32 %v575_v49 }
  0xa1   : > { %2163 = vmatprep.subr.bf16.mxu1 %v2728_v55  ;;  %v518_v55 = vadd.f32 1e-07, %v454_v47  ;;  %2780 = vlog2.f32 %v583_v51 }
  0xa3   : > { %2051 = vmatpush2.bf16.msra.mxu0 %v2730_v57  ;;  %v2757_v57 = vpop.eup %2756  ;;  %2782 = vrcp.f32 %v518_v55 }
  0xa4   : > { %2164 = vmatpush2.bf16.msra.mxu1 %v2731_v62  ;;  %2052 = vmatprep.subr.bf16.mxu0 %v2732_v63  ;;  %v2759_v53 = vpop.eup %2758  ;;  %v587_v62 = vmul.f32 %v2757_v57, %v387_v50  ;;  %v386_v63 = vadd.f32 1e-07, %v3698_v8  ;;  %2784 = vlog2.f32 %v579_v58  ;;  %v3771_v50 = vadd.f32 1e-07, %v3738_v60 }
  0xa5   : > { %2165 = vmatprep.subr.bf16.mxu1 %v2734_v2  ;;  %v2761_v61 = vpop.eup %2760  ;;  %v573_v1 = vmul.f32 %v2759_v53, %v380_v54 }
  0xa6   : > { %v2763_v2 = vpop.eup %2762  ;;  %2786 = vlog2.f32 %v587_v62  ;;  %v581_v0 = vmul.f32 %v2761_v61, %v384_v52 }
  0xa7   : > { %2053 = vmatpush2.bf16.msra.mxu0 %v2736_v9  ;;  %v2765_v5 = vpop.eup %2764  ;;  %2788 = vlog2.f32 %v573_v1  ;;  %v577_v6 = vmul.f32 %v2763_v2, %v382_v59  ;;  %v391_v9 = vadd.f32 1e-07, %v3711_v22  ;;  %v3758_v22 = vld [vmem:[%s3660_s12 + $0x98] sm:$0xff] }
  0xa8   : > { %2166 = vmatpush2.bf16.msra.mxu1 %v2737_v10  ;;  %2054 = vmatprep.subr.bf16.mxu0 %v2738_v16  ;;  %2790 = vlog2.f32 %v581_v0  ;;  %v585_v8 = vmul.f32 %v2765_v5, %v386_v63  ;;  %v3746_v10 = vld [vmem:[%s3660_s12 + $0x88] sm:$0xff]  ;;  %v2767_v11 = vpop.eup %2766  ;;  %v388_v16 = vadd.f32 1e-07, %v3719_v32  ;;  %v463_v32 = vsub.f32 1.0, %v3758_v22 }
  0xa9   : > { %2167 = vmatprep.subr.bf16.mxu1 %v2740_v17  ;;  %2792 = vlog2.f32 %v577_v6  ;;  %v2769_v13 = vpop.eup %2768  ;;  %v591_v14 = vmul.f32 %v2767_v11, %v389_v3  ;;  %v3753_v17 = vld [vmem:[%s3660_s12 + $0xa8] sm:$0xff]  ;;  %v461_v21 = vsub.f32 1.0, %v3746_v10 }
  0xaa   : > { %2794 = vlog2.f32 %v585_v8  ;;  %v2771_v18 = vpop.eup %2770  ;;  %v599_v19 = vmul.f32 %v2769_v13, %v393_v7  ;;  %v527_v46 = vadd.f32 1e-07, %v463_v32 }
  0xab   : > { %2055 = vmatpush2.bf16.msra.mxu0 %v2742_v23  ;;  %v2773_v23 = vpop.eup %2772  ;;  %2796 = vlog2.f32 %v591_v14  ;;  %v525_v35 = vadd.f32 1e-07, %v461_v21 }
  0xac   : > { %2168 = vmatpush2.bf16.msra.mxu1 %v2743_v24  ;;  %2056 = vmatprep.subr.bf16.mxu0 %v2744_v27  ;;  %v595_v24 = vmul.f32 %v2771_v18, %v391_v9  ;;  %v2775_v25 = vpop.eup %2774  ;;  %2798 = vlog2.f32 %v599_v19  ;;  %v603_v26 = vmul.f32 %v2773_v23, %v395_v12  ;;  %v465_v27 = vsub.f32 1.0, %v3753_v17 }
  0xad   : > { %2169 = vmatprep.subr.bf16.mxu1 %v2746_v34  ;;  %v2777_v29 = vpop.eup %2776  ;;  %v589_v30 = vmul.f32 %v2775_v25, %v388_v16  ;;  %2800 = vrcp.f32 %v522_v15 }
  0xae   : > { %v2779_v33 = vpop.eup %2778  ;;  %2802 = vlog2.f32 %v595_v24  ;;  %v597_v34 = vmul.f32 %v2777_v29, %v392_v20  ;;  %v529_v43 = vadd.f32 1e-07, %v465_v27 }
  0xaf   : > { %2057 = vmatpush2.bf16.msra.mxu0 %v2748_v41  ;;  %v2781_v36 = vpop.eup %2780  ;;  %v703_v37 = vmul.f32 0.6931472, %v2779_v33  ;;  %2804 = vlog2.f32 %v603_v26 }
  0xb0   : > { %2170 = vmatpush2.bf16.msra.mxu1 %v2749_v42  ;;  %v2783_v39 = vpop.eup %2782  ;;  %v711_v41 = vmul.f32 0.6931472, %v2781_v36  ;;  %v3768_v42 = vstv %s3748_s24  ;;  %2806 = vlog2.f32 %v589_v30 }
  0xb1   : > { %v2785_v44 = vpop.eup %2784  ;;  %v829_v40 = vmul.f32 10.0, %v703_v37  ;;  %2808 = vlog2.f32 %v597_v34  ;;  %v593_v45 = vmul.f32 %v2783_v39, %v390_v31 }
  0xb2   : > { %v833_v48 = vmul.f32 10.0, %v711_v41  ;;  %v707_v49 = vmul.f32 0.6931472, %v2785_v44  ;;  %2810 = vrcp.f32 %v525_v35 }
  0xb3   : > { %v2787_v47 = vpop.eup %2786  ;;  %v894_v54 = vadd.f32 %v3768_v42, %v829_v40  ;;  %2812 = vlog2.f32 %v593_v45 }
  0xb4   : > { %v2789_v51 = vpop.eup %2788  ;;  %v715_v55 = vmul.f32 0.6931472, %v2787_v47  ;;  %v898_v57 = vadd.f32 %v3768_v42, %v833_v48  ;;  %v831_v58 = vmul.f32 10.0, %v707_v49  ;;  %2814 = vrcp.f32 %v529_v43 }
  0xb5   : > { %v2791_v52 = vpop.eup %2790  ;;  %v701_v59 = vmul.f32 0.6931472, %v2789_v51  ;;  %v958_v62 = vsub.f32 0.0, %v894_v54  ;;  %2816 = vrcp.f32 %v527_v46 }
  0xb6   : > { %v2793_v53 = vpop.eup %2792  ;;  %v835_v63 = vmul.f32 10.0, %v715_v55  ;;  %v709_v61 = vmul.f32 0.6931472, %v2791_v52  ;;  %v962_v1 = vsub.f32 0.0, %v898_v57  ;;  %v896_v2 = vadd.f32 %v3768_v42, %v831_v58 }
  0xb7   : > { %v2795_v60 = vpop.eup %2794  ;;  %v828_v0 = vmul.f32 10.0, %v701_v59  ;;  %v705_v3 = vmul.f32 0.6931472, %v2793_v53  ;;  %v2437_v4 = vmul.f32 -1.442695, %v958_v62 }
  0xb8   : > { %v900_v5 = vadd.f32 %v3768_v42, %v835_v63  ;;  %v832_v6 = vmul.f32 10.0, %v709_v61  ;;  %v713_v7 = vmul.f32 0.6931472, %v2795_v60  ;;  %v2797_v8 = vpop.eup %2796  ;;  %v2441_v9 = vmul.f32 -1.442695, %v962_v1 }
  0xb9   : > { %v960_v11 = vsub.f32 0.0, %v896_v2  ;;  %v893_v12 = vadd.f32 %v3768_v42, %v828_v0  ;;  %v830_v13 = vmul.f32 10.0, %v705_v3  ;;  %v2799_v14 = vpop.eup %2798  ;;  %2818 = vpow2.f32 %v2437_v4 }
  0xba   : > { %v964_v16 = vsub.f32 0.0, %v900_v5  ;;  %v897_v15 = vadd.f32 %v3768_v42, %v832_v6  ;;  %v834_v18 = vmul.f32 10.0, %v713_v7  ;;  %v2801_v19 = vpop.eup %2800  ;;  %2820 = vpow2.f32 %v2441_v9 }
  0xbb   : > { %v2439_v20 = vmul.f32 -1.442695, %v960_v11  ;;  %v957_v21 = vsub.f32 0.0, %v893_v12  ;;  %v895_v23 = vadd.f32 %v3768_v42, %v830_v13  ;;  %v2803_v24 = vpop.eup %2802  ;;  %v719_v29 = vmul.f32 0.6931472, %v2797_v8 }
  0xbc   : > { %v2443_v25 = vmul.f32 -1.442695, %v964_v16  ;;  %v961_v26 = vsub.f32 0.0, %v897_v15  ;;  %v899_v27 = vadd.f32 %v3768_v42, %v834_v18  ;;  %v2805_v30 = vpop.eup %2804  ;;  %v727_v33 = vmul.f32 0.6931472, %v2799_v14 }
  0xbd   : > { %2822 = vpow2.f32 %v2439_v20  ;;  %v2436_v31 = vmul.f32 -1.442695, %v957_v21  ;;  %v959_v32 = vsub.f32 0.0, %v895_v23  ;;  %v2807_v34 = vpop.eup %2806  ;;  %v837_v37 = vmul.f32 10.0, %v719_v29 }
  0xbe   : > { %2824 = vpow2.f32 %v2443_v25  ;;  %v2440_v35 = vmul.f32 -1.442695, %v961_v26  ;;  %v963_v36 = vsub.f32 0.0, %v899_v27  ;;  %v2809_v38 = vpop.eup %2808  ;;  %v841_v41 = vmul.f32 10.0, %v727_v33  ;;  %v3802_v33 = vld [vmem:[%s3660_s12 + $0xa0] sm:$0xff] }
  0xbf   : > { %2826 = vpow2.f32 %v2436_v31  ;;  %v2438_v39 = vmul.f32 -1.442695, %v959_v32  ;;  %v723_v43 = vmul.f32 0.6931472, %v2803_v24  ;;  %v3783_v44 = vpop.eup %2810  ;;  %v902_v45 = vadd.f32 %v3768_v42, %v837_v37  ;;  %v332_v32 = vld [vmem:[%s3660_s12 + $0x80] sm:$0xff] }
  0xc0   : > { %2828 = vpow2.f32 %v2440_v35  ;;  %v2442_v40 = vmul.f32 -1.442695, %v963_v36  ;;  %v731_v46 = vmul.f32 0.6931472, %v2805_v30  ;;  %v2813_v47 = vpop.eup %2812  ;;  %v906_v48 = vadd.f32 %v3768_v42, %v841_v41  ;;  %v3810_v41 = vld [vmem:[%s3660_s12 + $0x90] sm:$0xff] }
  0xc1   : > { %2830 = vpow2.f32 %v2438_v39  ;;  %v839_v49 = vmul.f32 10.0, %v723_v43  ;;  %v717_v51 = vmul.f32 0.6931472, %v2807_v34  ;;  %v3787_v54 = vpop.eup %2814  ;;  %v966_v55 = vsub.f32 0.0, %v902_v45 }
  0xc2   : > { %2832 = vpow2.f32 %v2442_v40  ;;  %v843_v52 = vmul.f32 10.0, %v731_v46  ;;  %v725_v57 = vmul.f32 0.6931472, %v2809_v38  ;;  %v3789_v58 = vpop.eup %2816  ;;  %v970_v59 = vsub.f32 0.0, %v906_v48 }
  0xc3   : > { %v904_v53 = vadd.f32 %v3768_v42, %v839_v49  ;;  %v836_v62 = vmul.f32 10.0, %v717_v51  ;;  %v601_v63 = vmul.f32 %v2801_v19, %v3771_v50  ;;  %v2445_v61 = vmul.f32 -1.442695, %v966_v55 }
  0xc4   : > { %v908_v60 = vadd.f32 %v3768_v42, %v843_v52  ;;  %v840_v1 = vmul.f32 10.0, %v725_v57  ;;  %v721_v2 = vmul.f32 0.6931472, %v2813_v47  ;;  %v2449_v0 = vmul.f32 -1.442695, %v970_v59  ;;  %v3815_v47 = vld [vmem:[%s3660_s12 + $0xb0] sm:$0xff] }
  0xc5   : > { %v968_v3 = vsub.f32 0.0, %v904_v53  ;;  %2834 = vlog2.f32 %v601_v63  ;;  %v901_v8 = vadd.f32 %v3768_v42, %v836_v62  ;;  %v397_v36 = vadd.f32 1e-07, %v3746_v10  ;;  %v3824_v63 = vld [vmem:[%s3660_s12 + $0xc8] sm:$0xff] }
  0xc6   : > { %2836 = vpow2.f32 %v2445_v61  ;;  %v972_v4 = vsub.f32 0.0, %v908_v60  ;;  %v838_v5 = vmul.f32 10.0, %v721_v2  ;;  %v2819_v6 = vpop.eup %2818  ;;  %v905_v50 = vadd.f32 %v3768_v42, %v840_v1 }
  0xc7   : > { %2838 = vpow2.f32 %v2449_v0  ;;  %v2447_v7 = vmul.f32 -1.442695, %v968_v3  ;;  %v2821_v9 = vpop.eup %2820  ;;  %v1214_v11 = vadd.f32 1.0, %v2819_v6  ;;  %v965_v19 = vsub.f32 0.0, %v901_v8  ;;  %v1410_v6 = vld [vmem:[%s3653_s9 + $0x28] sm:$0xff] }
  0xc8   : > { %v2451_v12 = vmul.f32 -1.442695, %v972_v4  ;;  %2840 = vrcp.f32 %v3774_v56  ;;  %v1218_v13 = vadd.f32 1.0, %v2821_v9  ;;  %v903_v14 = vadd.f32 %v3768_v42, %v838_v5 }
  0xc9   : > { %2842 = vpow2.f32 %v2447_v7  ;;  %v969_v23 = vsub.f32 0.0, %v905_v50  ;;  %v2444_v31 = vmul.f32 -1.442695, %v965_v19  ;;  %v3806_v37 = vstv %s3797_s15 }
  0xca   : > { %v2823_v16 = vpop.eup %2822  ;;  %2844 = vrcp.f32 %v1214_v11  ;;  %v967_v25 = vsub.f32 0.0, %v903_v14  ;;  %v401_v39 = vadd.f32 1e-07, %v3753_v17  ;;  %v399_v40 = vadd.f32 1e-07, %v3758_v22 }
  0xcb   : > { %v2825_v15 = vpop.eup %2824  ;;  %2846 = vrcp.f32 %v1218_v13  ;;  %v1216_v18 = vadd.f32 1.0, %v2823_v16  ;;  %v2448_v35 = vmul.f32 -1.442695, %v969_v23  ;;  %v460_v45 = vsub.f32 1.0, %v332_v32  ;;  %v3837_v13 = vld [vmem:[%s3660_s12 + $0xe8] sm:$0xff]  ;;  %v1408_v16 = vld [vmem:[%s3653_s9 + $0x18] sm:$0xff] }
  0xcc   : > { %v2827_v20 = vpop.eup %2826  ;;  %v1220_v21 = vadd.f32 1.0, %v2825_v15  ;;  %2848 = vpow2.f32 %v2451_v12  ;;  %v2446_v38 = vmul.f32 -1.442695, %v967_v25  ;;  %v464_v46 = vsub.f32 1.0, %v3802_v33 }
  0xcd   : > { %v2829_v24 = vpop.eup %2828  ;;  %2850 = vrcp.f32 %v1216_v18  ;;  %v1213_v56 = vadd.f32 1.0, %v2827_v20  ;;  %v403_v49 = vadd.f32 1e-07, %v3762_v28  ;;  %v3818_v51 = vadd.f32 1e-07, %v332_v32 }
  0xce   : > { %v2831_v26 = vpop.eup %2830  ;;  %2852 = vrcp.f32 %v1220_v21  ;;  %v1217_v27 = vadd.f32 1.0, %v2829_v24  ;;  %v607_v52 = vmul.f32 %v3783_v44, %v397_v36  ;;  %v462_v22 = vsub.f32 1.0, %v3810_v41  ;;  %v1406_v44 = vld [vmem:[%s3653_s9 + $0x8] sm:$0xff]  ;;  %v1412_v21 = vld [vmem:[%s3653_s9 + $0x38] sm:$0xff]  ;;  %v1409_v36 = vld [vmem:[%s3653_s9 + $0x20] sm:$0xff] }
  0xcf   : > { %v2833_v29 = vpop.eup %2832  ;;  %2854 = vrcp.f32 %v1213_v56  ;;  %v1215_v30 = vadd.f32 1.0, %v2831_v26  ;;  %v466_v62 = vsub.f32 1.0, %v3815_v47  ;;  %v615_v61 = vmul.f32 %v3787_v54, %v401_v39  ;;  %v3843_v56 = vld [vmem:[%s3660_s12 + $0xd8] sm:$0xff] }
  0xd0   : > { %2856 = vrcp.f32 %v1217_v27  ;;  %v1219_v34 = vadd.f32 1.0, %v2833_v29  ;;  %v524_v60 = vadd.f32 1e-07, %v460_v45  ;;  %v3827_v1 = vadd.f32 1e-07, %v464_v46  ;;  %v1405_v27 = vld [vmem:[%s3653_s9] sm:$0xff] }
  0xd1   : > { %2858 = vrcp.f32 %v1215_v30  ;;  %v611_v4 = vmul.f32 %v3789_v58, %v399_v40  ;;  %v526_v8 = vadd.f32 1e-07, %v462_v22  ;;  %v469_v54 = vsub.f32 1.0, %v3824_v63  ;;  %v1407_v45 = vld [vmem:[%s3653_s9 + $0x10] sm:$0xff] }
  0xd2   : > { %v2835_v43 = vpop.eup %2834  ;;  %2860 = vrcp.f32 %v1219_v34  ;;  %v530_v50 = vadd.f32 1e-07, %v466_v62  ;;  %v473_v29 = vsub.f32 1.0, %v3837_v13  ;;  %v471_v46 = vsub.f32 1.0, %v3843_v56  ;;  %v3865_v62 = vld [vmem:[%s3660_s12 + $0xe0] sm:$0xff] }
  0xd3   : > { %v2837_v48 = vpop.eup %2836  ;;  %2862 = vpow2.f32 %v2444_v31  ;;  %v729_v10 = vmul.f32 0.6931472, %v2835_v43  ;;  %v533_v30 = vadd.f32 1e-07, %v469_v54  ;;  %v3849_v31 = vld [vmem:[%s3660_s12 + $0xf8] sm:$0xff]  ;;  %v472_v54 = vsub.f32 1.0, %v3865_v62 }
  0xd4   : > { %v2839_v17 = vpop.eup %2838  ;;  %v1222_v55 = vadd.f32 1.0, %v2837_v48  ;;  %2864 = vpow2.f32 %v2448_v35  ;;  %v3857_v48 = vld [vmem:[%s3660_s12 + $0xc0] sm:$0xff] }
  0xd5   : > { %v2841_v57 = vpop.eup %2840  ;;  %v1226_v59 = vadd.f32 1.0, %v2839_v17  ;;  %v842_v53 = vmul.f32 10.0, %v729_v10  ;;  %2866 = vpow2.f32 %v2446_v38  ;;  %v1411_v17 = vld [vmem:[%s3653_s9 + $0x30] sm:$0xff] }
  0xd6   : > { %v2843_v28 = vpop.eup %2842  ;;  %2868 = vrcp.f32 %v1222_v55  ;;  %v619_v18 = vmul.f32 %v2841_v57, %v403_v49 }
  0xd7   : > { %v2845_v2 = vpop.eup %2844  ;;  %2870 = vrcp.f32 %v1226_v59  ;;  %v1224_v0 = vadd.f32 1.0, %v2843_v28  ;;  %v907_v3 = vadd.f32 %v3768_v42, %v842_v53 }
  0xd8   : > { %v2847_v5 = vpop.eup %2846  ;;  %v1471_v7 = vmul.f32 %v2845_v2, %v3806_v37  ;;  %2872 = vlog2.f32 %v607_v52  ;;  %v475_v52 = vsub.f32 1.0, %v3849_v31 }
  0xd9   : > { %v2849_v9 = vpop.eup %2848  ;;  %v1475_v11 = vmul.f32 %v2847_v5, %v3806_v37  ;;  %2874 = vrcp.f32 %v1224_v0  ;;  %v971_v12 = vsub.f32 0.0, %v907_v3 }
  0xda   : > { %v2851_v58 = vpop.eup %2850  ;;  %v1535_v14 = vmul.f32 %v1471_v7, %v1406_v44  ;;  %v1228_v15 = vadd.f32 1.0, %v2849_v9  ;;  %2876 = vlog2.f32 %v615_v61  ;;  %v468_v44 = vsub.f32 1.0, %v3857_v48 }
  0xdb   : > { %v2853_v19 = vpop.eup %2852  ;;  %v1539_v20 = vmul.f32 %v1475_v11, %v1410_v6  ;;  %v1473_v23 = vmul.f32 %v2851_v58, %v3806_v37  ;;  %v2450_v24 = vmul.f32 -1.442695, %v971_v12  ;;  %2878 = vlog2.f32 %v611_v4  ;;  %v1414_v6 = vld [vmem:[%s3653_s9 + $0x48] sm:$0xff] }
  0xdc   : > { %v2855_v25 = vpop.eup %2854  ;;  %v1477_v26 = vmul.f32 %v2853_v19, %v3806_v37  ;;  %2880 = vrcp.f32 %v1228_v15  ;;  %v1418_v11 = vld [vmem:[%s3653_s9 + $0x68] sm:$0xff]  ;;  %v535_v58 = vadd.f32 1e-07, %v471_v46  ;;  %v539_v15 = vadd.f32 1e-07, %v475_v52 }
  0xdd   : > { %v2857_v32 = vpop.eup %2856  ;;  %v1599_v34 = vpack.c.bf16 %v1539_v20, %v1535_v14  ;;  %v1537_v35 = vmul.f32 %v1473_v23, %v1408_v16  ;;  %v1470_v38 = vmul.f32 %v2855_v25, %v3806_v37  ;;  %2882 = vpow2.f32 %v2450_v24  ;;  %v1416_v20 = vld [vmem:[%s3653_s9 + $0x58] sm:$0xff] }
  0xde   : > { %v2859_v39 = vpop.eup %2858  ;;  %v1541_v43 = vmul.f32 %v1477_v26, %v1412_v21  ;;  %v1474_v40 = vmul.f32 %v2857_v32, %v3806_v37  ;;  %2884 = vlog2.f32 %v619_v18  ;;  %v532_v23 = vadd.f32 1e-07, %v468_v44 }
  0xdf   : > { %v2861_v10 = vpop.eup %2860  ;;  %2058 = vmatprep.mubr.bf16.mxu0 %v1599_v34  ;;  %v1534_v49 = vmul.f32 %v1470_v38, %v1405_v27  ;;  %v1472_v55 = vmul.f32 %v2859_v39, %v3806_v37  ;;  %2886 = vrcp.f32 %v524_v60  ;;  %v536_v27 = vadd.f32 1e-07, %v472_v54  ;;  %v1420_v38 = vld [vmem:[%s3653_s9 + $0x78] sm:$0xff]  ;;  %v1413_v54 = vld [vmem:[%s3653_s9 + $0x40] sm:$0xff] }
  0xe0   : > { %v2863_v22 = vpop.eup %2862  ;;  %v1601_v57 = vpack.c.bf16 %v1541_v43, %v1537_v35  ;;  %v1538_v59 = vmul.f32 %v1474_v40, %v1409_v36  ;;  %v1476_v53 = vmul.f32 %v2861_v10, %v3806_v37  ;;  %2888 = vrcp.f32 %v3827_v1 }
  0xe1   : > { %v2865_v28 = vpop.eup %2864  ;;  %v1536_v61 = vmul.f32 %v1472_v55, %v1407_v45  ;;  %v1221_v2 = vadd.f32 1.0, %v2863_v22  ;;  %2890 = vrcp.f32 %v526_v8  ;;  %v537_v1 = vadd.f32 1e-07, %v473_v29 }
  0xe2   : > { %v2867_v60 = vpop.eup %2866  ;;  %2171 = vmatprep.mubr.bf16.mxu1 %v1601_v57  ;;  %v1598_v0 = vpack.c.bf16 %v1538_v59, %v1534_v49  ;;  %v1540_v3 = vmul.f32 %v1476_v53, %v1411_v17  ;;  %v1225_v4 = vadd.f32 1.0, %v2865_v28  ;;  %2892 = vrcp.f32 %v530_v50 }
  0xe3   : > { %v2869_v5 = vpop.eup %2868  ;;  %2894 = vrcp.f32 %v1221_v2  ;;  %v1223_v7 = vadd.f32 1.0, %v2867_v60  ;;  %v400_v50 = vadd.f32 1e-07, %v3802_v33  ;;  %v398_v33 = vadd.f32 1e-07, %v3810_v41 }
  0xe4   : > { %v2871_v9 = vpop.eup %2870  ;;  %2059 = vmatmul.mubr.bf16.vlgmr.msra.gmra.mxu0 %v1598_v0  ;;  %v1600_v8 = vpack.c.bf16 %v1540_v3, %v1536_v61  ;;  %v1479_v12 = vmul.f32 %v2869_v5, %v3806_v37  ;;  %2896 = vrcp.f32 %v1225_v4  ;;  %v402_v41 = vadd.f32 1e-07, %v3815_v47 }
  0xe5   : > { %v2873_v14 = vpop.eup %2872  ;;  %v1483_v16 = vmul.f32 %v2871_v9, %v3806_v37  ;;  %2898 = vrcp.f32 %v1223_v7  ;;  %v405_v2 = vadd.f32 1e-07, %v3824_v63  ;;  %v409_v7 = vadd.f32 1e-07, %v3837_v13 }
  0xe6   : > { %v2875_v18 = vpop.eup %2874  ;;  %2172 = vmatmul.mubr.bf16.vlgmr.msra.gmra.mxu1 %v1600_v8  ;;  %v1543_v19 = vmul.f32 %v1479_v12, %v1414_v6  ;;  %v735_v21 = vmul.f32 0.6931472, %v2873_v14  ;;  %2900 = vrcp.f32 %v533_v30 }
  0xe7   : > { %v2877_v24 = vpop.eup %2876  ;;  %v1547_v25 = vmul.f32 %v1483_v16, %v1418_v11  ;;  %v1481_v26 = vmul.f32 %v2875_v18, %v3806_v37  ;;  %2902 = vrcp.f32 %v537_v1  ;;  %v1417_v11 = vld [vmem:[%s3653_s9 + $0x60] sm:$0xff]  ;;  %v3893_v18 = vld [vmem:[%s3660_s12 + $0xd0] sm:$0xff] }
  0xe8   : > { %v2879_v29 = vpop.eup %2878  ;;  %v743_v32 = vmul.f32 0.6931472, %v2877_v24  ;;  %v845_v34 = vmul.f32 10.0, %v735_v21  ;;  %2904 = vrcp.f32 %v535_v58  ;;  %v411_v21 = vadd.f32 1e-07, %v3849_v31  ;;  %v3898_v24 = vld [vmem:[%s3660_s12 + $0xf0] sm:$0xff] }
  0xe9   : > { %v2881_v35 = vpop.eup %2880  ;;  %v1603_v36 = vpack.c.bf16 %v1547_v25, %v1543_v19  ;;  %v1545_v39 = vmul.f32 %v1481_v26, %v1416_v20  ;;  %v739_v43 = vmul.f32 0.6931472, %v2879_v29  ;;  %2906 = vrcp.f32 %v539_v15 }
  0xea   : > { %v2883_v30 = vpop.eup %2882  ;;  %v1485_v40 = vmul.f32 %v2881_v35, %v3806_v37  ;;  %v849_v45 = vmul.f32 10.0, %v743_v32  ;;  %v910_v46 = vadd.f32 %v3768_v42, %v845_v34  ;;  %2908 = vrcp.f32 %v532_v23  ;;  %v3901_v32 = vld [vmem:[%s3660_s12 + $0x108] sm:$0xff] }
  0xeb   : > { %v2885_v10 = vpop.eup %2884  ;;  %2068 = vmatprep.mubr.bf16.mxu0 %v1603_v36  ;;  %v1227_v49 = vadd.f32 1.0, %v2883_v30  ;;  %v847_v17 = vmul.f32 10.0, %v739_v43  ;;  %2910 = vrcp.f32 %v536_v27  ;;  %v407_v15 = vadd.f32 1e-07, %v3843_v56 }
  0xec   : > { %v2887_v55 = vpop.eup %2886  ;;  %v1549_v52 = vmul.f32 %v1485_v40, %v1420_v38  ;;  %v914_v22 = vadd.f32 %v3768_v42, %v849_v45  ;;  %v974_v57 = vsub.f32 0.0, %v910_v46  ;;  %v747_v59 = vmul.f32 0.6931472, %v2885_v10  ;;  %v1415_v46 = vld [vmem:[%s3653_s9 + $0x50] sm:$0xff] }
  0xed   : > { %v2889_v53 = vpop.eup %2888  ;;  %2912 = vrcp.f32 %v1227_v49  ;;  %v912_v28 = vadd.f32 %v3768_v42, %v847_v17  ;;  %v605_v61 = vmul.f32 %v2887_v55, %v3818_v51  ;;  %v404_v23 = vadd.f32 1e-07, %v3857_v48  ;;  %v3914_v55 = vld [vmem:[%s3660_s12 + $0x118] sm:$0xff] }
  0xee   : > { %v2891_v44 = vpop.eup %2890  ;;  %v1605_v60 = vpack.c.bf16 %v1549_v52, %v1545_v39  ;;  %v978_v0 = vsub.f32 0.0, %v914_v22  ;;  %v2453_v47 = vmul.f32 -1.442695, %v974_v57  ;;  %v851_v3 = vmul.f32 10.0, %v747_v59  ;;  %v3907_v39 = vld [vmem:[%s3660_s12 + $0x128] sm:$0xff]  ;;  %v1419_v22 = vld [vmem:[%s3653_s9 + $0x70] sm:$0xff] }
  0xef   : > { %v2893_v4 = vpop.eup %2892  ;;  %v976_v5 = vsub.f32 0.0, %v912_v28  ;;  %v613_v6 = vmul.f32 %v2889_v53, %v400_v50  ;;  %2914 = vlog2.f32 %v605_v61  ;;  %v609_v9 = vmul.f32 %v2891_v44, %v398_v33 }
  0xf0   : > { %v2895_v1 = vpop.eup %2894  ;;  %2181 = vmatprep.mubr.bf16.mxu1 %v1605_v60  ;;  %2916 = vpow2.f32 %v2453_v47  ;;  %v2457_v51 = vmul.f32 -1.442695, %v978_v0  ;;  %v916_v63 = vadd.f32 %v3768_v42, %v851_v3  ;;  %v617_v14 = vmul.f32 %v2893_v4, %v402_v41 }
  0xf1   : > { %v2897_v8 = vpop.eup %2896  ;;  %v1478_v12 = vmul.f32 %v2895_v1, %v3806_v37  ;;  %v2455_v58 = vmul.f32 -1.442695, %v976_v5  ;;  %2918 = vlog2.f32 %v613_v6  ;;  %v408_v33 = vadd.f32 1e-07, %v3865_v62 }
  0xf2   : > { %v2899_v16 = vpop.eup %2898  ;;  %v1482_v13 = vmul.f32 %v2897_v8, %v3806_v37  ;;  %2920 = vpow2.f32 %v2457_v51  ;;  %v980_v50 = vsub.f32 0.0, %v916_v63  ;;  %v470_v31 = vsub.f32 1.0, %v3893_v18 }
  0xf3   : > { %v2901_v19 = vpop.eup %2900  ;;  %v1542_v20 = vmul.f32 %v1478_v12, %v1413_v54  ;;  %2922 = vpow2.f32 %v2455_v58  ;;  %v474_v38 = vsub.f32 1.0, %v3898_v24  ;;  %v1480_v30 = vmul.f32 %v2899_v16, %v3806_v37 }
  0xf4   : > { %v2903_v25 = vpop.eup %2902  ;;  %v1546_v26 = vmul.f32 %v1482_v13, %v1417_v11  ;;  %v2459_v27 = vmul.f32 -1.442695, %v980_v50  ;;  %2924 = vlog2.f32 %v609_v9  ;;  %v623_v29 = vmul.f32 %v2901_v19, %v405_v2 }
  0xf5   : > { %v2905_v56 = vpop.eup %2904  ;;  %2926 = vlog2.f32 %v617_v14  ;;  %v631_v34 = vmul.f32 %v2903_v25, %v409_v7  ;;  %v477_v45 = vsub.f32 1.0, %v3901_v32  ;;  %v534_v17 = vadd.f32 1e-07, %v470_v31 }
  0xf6   : > { %v2907_v35 = vpop.eup %2906  ;;  %v1602_v48 = vpack.c.bf16 %v1546_v26, %v1542_v20  ;;  %2928 = vpow2.f32 %v2459_v27  ;;  %v627_v36 = vmul.f32 %v2905_v56, %v407_v15  ;;  %v481_v41 = vsub.f32 1.0, %v3907_v39 }
  0xf7   : > { %v2909_v43 = vpop.eup %2908  ;;  %2930 = vlog2.f32 %v623_v29  ;;  %v635_v40 = vmul.f32 %v2907_v35, %v411_v21  ;;  %v538_v57 = vadd.f32 1e-07, %v474_v38  ;;  %v1544_v53 = vmul.f32 %v1480_v30, %v1415_v46 }
  0xf8   : > { %v2911_v62 = vpop.eup %2910  ;;  %2069 = vmatmul.mubr.bf16.gmra.mxu0 %v1602_v48  ;;  %2932 = vlog2.f32 %v631_v34  ;;  %v621_v10 = vmul.f32 %v2909_v43, %v404_v23  ;;  %v541_v28 = vadd.f32 1e-07, %v477_v45  ;;  %v479_v2 = vsub.f32 1.0, %v3914_v55 }
  0xf9   : > { %2934 = vlog2.f32 %v627_v36  ;;  %v629_v49 = vmul.f32 %v2911_v62, %v408_v33  ;;  %v545_v47 = vadd.f32 1e-07, %v481_v41  ;;  %v406_v31 = vadd.f32 1e-07, %v3893_v18 }
  0xfa   : > { %v2913_v52 = vpop.eup %2912  ;;  %2936 = vlog2.f32 %v635_v40  ;;  %v543_v63 = vadd.f32 1e-07, %v479_v2 }
  0xfb   : > { %v1484_v59 = vmul.f32 %v2913_v52, %v3806_v37  ;;  %2938 = vlog2.f32 %v621_v10 }
  0xfc   : > { %v2915_v61 = vpop.eup %2914  ;;  %2940 = vlog2.f32 %v629_v49 }
  0xfd   : > { %v2917_v44 = vpop.eup %2916  ;;  %v1548_v60 = vmul.f32 %v1484_v59, %v1419_v22  ;;  %v733_v0 = vmul.f32 0.6931472, %v2915_v61  ;;  %2942 = vrcp.f32 %v534_v17 }
  0xfe   : > { %v2919_v3 = vpop.eup %2918  ;;  %v1230_v4 = vadd.f32 1.0, %v2917_v44  ;;  %2944 = vrcp.f32 %v538_v57 }
  0xff   : > { %v2921_v5 = vpop.eup %2920  ;;  %v1604_v6 = vpack.c.bf16 %v1548_v60, %v1544_v53  ;;  %v741_v7 = vmul.f32 0.6931472, %v2919_v3  ;;  %v844_v1 = vmul.f32 10.0, %v733_v0  ;;  %2946 = vrcp.f32 %v541_v28 }
 0x100   : > { %v2923_v54 = vpop.eup %2922  ;;  %v1234_v51 = vadd.f32 1.0, %v2921_v5  ;;  %2948 = vrcp.f32 %v1230_v4  ;;  %v1422_v4 = vld [vmem:[%s3653_s9 + $0x88] sm:$0xff] }
 0x101   : > { %v2925_v9 = vpop.eup %2924  ;;  %2182 = vmatmul.mubr.bf16.gmra.mxu1 %v1604_v6  ;;  %v1232_v8 = vadd.f32 1.0, %v2923_v54  ;;  %v848_v11 = vmul.f32 10.0, %v741_v7  ;;  %v909_v12 = vadd.f32 %v3768_v42, %v844_v1  ;;  %2950 = vrcp.f32 %v545_v47 }
 0x102   : > { %v2927_v58 = vpop.eup %2926  ;;  %2952 = vrcp.f32 %v1234_v51  ;;  %v737_v14 = vmul.f32 0.6931472, %v2925_v9 }
 0x103   : > { %v2929_v16 = vpop.eup %2928  ;;  %2954 = vrcp.f32 %v1232_v8  ;;  %v913_v13 = vadd.f32 %v3768_v42, %v848_v11  ;;  %v973_v50 = vsub.f32 0.0, %v909_v12  ;;  %v745_v15 = vmul.f32 0.6931472, %v2927_v58  ;;  %v1426_v11 = vld [vmem:[%s3653_s9 + $0xa8] sm:$0xff] }
 0x104   : > { %v2931_v19 = vpop.eup %2930  ;;  %v1236_v20 = vadd.f32 1.0, %v2929_v16  ;;  %v846_v21 = vmul.f32 10.0, %v737_v14  ;;  %2956 = vrcp.f32 %v543_v63  ;;  %v410_v14 = vadd.f32 1e-07, %v3898_v24 }
 0x105   : > { %v2933_v23 = vpop.eup %2932  ;;  %v977_v25 = vsub.f32 0.0, %v913_v13  ;;  %v2452_v26 = vmul.f32 -1.442695, %v973_v50  ;;  %v850_v27 = vmul.f32 10.0, %v745_v15  ;;  %v751_v29 = vmul.f32 0.6931472, %v2931_v19 }
 0x106   : > { %v2935_v56 = vpop.eup %2934  ;;  %2958 = vrcp.f32 %v1236_v20  ;;  %v911_v34 = vadd.f32 %v3768_v42, %v846_v21  ;;  %v759_v33 = vmul.f32 0.6931472, %v2933_v23  ;;  %v1424_v20 = vld [vmem:[%s3653_s9 + $0x98] sm:$0xff]  ;;  %v413_v24 = vadd.f32 1e-07, %v3901_v32 }
 0x107   : > { %v2937_v35 = vpop.eup %2936  ;;  %2960 = vpow2.f32 %v2452_v26  ;;  %v2456_v48 = vmul.f32 -1.442695, %v977_v25  ;;  %v915_v36 = vadd.f32 %v3768_v42, %v850_v27  ;;  %v853_v38 = vmul.f32 10.0, %v751_v29 }
 0x108   : > { %v2939_v43 = vpop.eup %2938  ;;  %v975_v30 = vsub.f32 0.0, %v911_v34  ;;  %v857_v40 = vmul.f32 10.0, %v759_v33  ;;  %v755_v45 = vmul.f32 0.6931472, %v2935_v56  ;;  %v763_v62 = vmul.f32 0.6931472, %v2937_v35 }
 0x109   : > { %v2941_v46 = vpop.eup %2940  ;;  %2962 = vpow2.f32 %v2456_v48  ;;  %v979_v10 = vsub.f32 0.0, %v915_v36  ;;  %v918_v49 = vadd.f32 %v3768_v42, %v853_v38  ;;  %v749_v17 = vmul.f32 0.6931472, %v2939_v43  ;;  %v1428_v34 = vld [vmem:[%s3653_s9 + $0xb8] sm:$0xff] }
 0x10a   : > { %v2943_v41 = vpop.eup %2942  ;;  %v2454_v18 = vmul.f32 -1.442695, %v975_v30  ;;  %v922_v52 = vadd.f32 %v3768_v42, %v857_v40  ;;  %v855_v22 = vmul.f32 10.0, %v755_v45  ;;  %v859_v57 = vmul.f32 10.0, %v763_v62  ;;  %v355_v36 = vld [vmem:[%s3660_s12 + $0x138] sm:$0xff] }
 0x10b   : > { %v2945_v59 = vpop.eup %2944  ;;  %v2458_v53 = vmul.f32 -1.442695, %v979_v10  ;;  %v982_v28 = vsub.f32 0.0, %v918_v49  ;;  %v757_v61 = vmul.f32 0.6931472, %v2941_v46  ;;  %v852_v2 = vmul.f32 10.0, %v749_v17 }
 0x10c   : > { %v2947_v44 = vpop.eup %2946  ;;  %2964 = vpow2.f32 %v2454_v18  ;;  %v986_v60 = vsub.f32 0.0, %v922_v52  ;;  %v920_v0 = vadd.f32 %v3768_v42, %v855_v22  ;;  %v924_v47 = vadd.f32 %v3768_v42, %v859_v57 }
 0x10d   : > { %v2949_v3 = vpop.eup %2948  ;;  %2966 = vpow2.f32 %v2458_v53  ;;  %v2461_v5 = vmul.f32 -1.442695, %v982_v28  ;;  %v856_v6 = vmul.f32 10.0, %v757_v61  ;;  %v917_v7 = vadd.f32 %v3768_v42, %v852_v2  ;;  %v352_v28 = vld [vmem:[%s3660_s12 + $0x120] sm:$0xff] }
 0x10e   : > { %v2951_v1 = vpop.eup %2950  ;;  %v1487_v54 = vmul.f32 %v2949_v3, %v3806_v37  ;;  %v2465_v51 = vmul.f32 -1.442695, %v986_v60  ;;  %v984_v63 = vsub.f32 0.0, %v920_v0  ;;  %v988_v9 = vsub.f32 0.0, %v924_v47  ;;  %v350_v60 = vld [vmem:[%s3660_s12 + $0x110] sm:$0xff] }
 0x10f   : > { %v2953_v8 = vpop.eup %2952  ;;  %2968 = vpow2.f32 %v2461_v5  ;;  %v921_v12 = vadd.f32 %v3768_v42, %v856_v6  ;;  %v981_v58 = vsub.f32 0.0, %v917_v7  ;;  %v625_v29 = vmul.f32 %v2943_v41, %v406_v31  ;;  %v354_v47 = vld [vmem:[%s3660_s12 + $0x130] sm:$0xff]  ;;  %v357_v7 = vld [vmem:[%s3660_s12 + $0x148] sm:$0xff] }
 0x110   : > { %v2955_v16 = vpop.eup %2954  ;;  %v1491_v13 = vmul.f32 %v2953_v8, %v3806_v37  ;;  %v1551_v50 = vmul.f32 %v1487_v54, %v1422_v4  ;;  %2970 = vpow2.f32 %v2465_v51  ;;  %v2463_v15 = vmul.f32 -1.442695, %v984_v63 }
 0x111   : > { %v2957_v19 = vpop.eup %2956  ;;  %v1489_v21 = vmul.f32 %v2955_v16, %v3806_v37  ;;  %v2467_v23 = vmul.f32 -1.442695, %v988_v9  ;;  %v985_v25 = vsub.f32 0.0, %v921_v12  ;;  %v2460_v26 = vmul.f32 -1.442695, %v981_v58  ;;  %v3955_v9 = vld [vmem:[%s3660_s12 + $0x168] sm:$0xff] }
 0x112   : > { %v1555_v27 = vmul.f32 %v1491_v13, %v1426_v11  ;;  %2972 = vpow2.f32 %v2463_v15  ;;  %v633_v35 = vmul.f32 %v2945_v59, %v410_v14  ;;  %v417_v48 = vadd.f32 1e-07, %v3907_v39  ;;  %v348_v59 = vld [vmem:[%s3660_s12 + $0x100] sm:$0xff] }
 0x113   : > { %v2959_v56 = vpop.eup %2958  ;;  %2974 = vpow2.f32 %v2467_v23  ;;  %v2464_v33 = vmul.f32 -1.442695, %v985_v25  ;;  %v1553_v40 = vmul.f32 %v1489_v21, %v1424_v20  ;;  %v639_v32 = vmul.f32 %v2947_v44, %v413_v24 }
 0x114   : > { %v2961_v38 = vpop.eup %2960  ;;  %v1607_v43 = vpack.c.bf16 %v1555_v27, %v1551_v50  ;;  %v1493_v30 = vmul.f32 %v2959_v56, %v3806_v37  ;;  %2976 = vpow2.f32 %v2460_v26  ;;  %v483_v46 = vsub.f32 1.0, %v355_v36  ;;  %v1425_v56 = vld [vmem:[%s3653_s9 + $0xa0] sm:$0xff] }
 0x115   : > { %v1229_v45 = vadd.f32 1.0, %v2961_v38  ;;  %2978 = vpow2.f32 %v2464_v33  ;;  %v647_v49 = vmul.f32 %v2951_v1, %v417_v48  ;;  %v415_v41 = vadd.f32 1e-07, %v3914_v55 }
 0x116   : > { %v2963_v62 = vpop.eup %2962  ;;  %2078 = vmatprep.mubr.bf16.mxu0 %v1607_v43  ;;  %v1557_v31 = vmul.f32 %v1493_v30, %v1428_v34  ;;  %2980 = vlog2.f32 %v625_v29  ;;  %v547_v22 = vadd.f32 1e-07, %v483_v46  ;;  %v476_v0 = vsub.f32 1.0, %v348_v59  ;;  %v3968_v30 = vld [vmem:[%s3660_s12 + $0x158] sm:$0xff] }
 0x117   : > { %v1233_v10 = vadd.f32 1.0, %v2963_v62  ;;  %2982 = vrcp.f32 %v1229_v45  ;;  %v643_v44 = vmul.f32 %v2957_v19, %v415_v41  ;;  %v3947_v4 = vadd.f32 1e-07, %v355_v36  ;;  %v1421_v19 = vld [vmem:[%s3653_s9 + $0x80] sm:$0xff]  ;;  %v1423_v41 = vld [vmem:[%s3653_s9 + $0x90] sm:$0xff] }
 0x118   : > { %v1609_v39 = vpack.c.bf16 %v1557_v31, %v1553_v40  ;;  %2984 = vlog2.f32 %v633_v35  ;;  %v3949_v5 = vadd.f32 1e-07, %v348_v59  ;;  %v480_v6 = vsub.f32 1.0, %v352_v28 }
 0x119   : > { %v2965_v17 = vpop.eup %2964  ;;  %2986 = vrcp.f32 %v1233_v10  ;;  %v3952_v51 = vadd.f32 1e-07, %v352_v28  ;;  %v478_v63 = vsub.f32 1.0, %v350_v60  ;;  %v3957_v12 = vadd.f32 1e-07, %v350_v60 }
 0x11a   : > { %v2967_v18 = vpop.eup %2966  ;;  %2191 = vmatprep.mubr.bf16.mxu1 %v1609_v39  ;;  %v1231_v52 = vadd.f32 1.0, %v2965_v17  ;;  %2988 = vlog2.f32 %v639_v32  ;;  %v482_v58 = vsub.f32 1.0, %v354_v47  ;;  %v540_v13 = vadd.f32 1e-07, %v476_v0 }
 0x11b   : > { %v1235_v57 = vadd.f32 1.0, %v2967_v18  ;;  %2990 = vlog2.f32 %v647_v49  ;;  %v485_v50 = vsub.f32 1.0, %v357_v7  ;;  %v544_v21 = vadd.f32 1e-07, %v480_v6 }
 0x11c   : > { %v2969_v53 = vpop.eup %2968  ;;  %2992 = vrcp.f32 %v1231_v52  ;;  %v489_v23 = vsub.f32 1.0, %v3955_v9  ;;  %v3961_v27 = vadd.f32 1e-07, %v354_v47  ;;  %v542_v29 = vadd.f32 1e-07, %v478_v63 }
 0x11d   : > { %v2971_v61 = vpop.eup %2970  ;;  %2994 = vrcp.f32 %v1235_v57  ;;  %v1238_v2 = vadd.f32 1.0, %v2969_v53  ;;  %v546_v33 = vadd.f32 1e-07, %v482_v58  ;;  %v3965_v35 = vadd.f32 1e-07, %v357_v7  ;;  %v1427_v57 = vld [vmem:[%s3653_s9 + $0xb0] sm:$0xff] }
 0x11e   : > { %v1242_v55 = vadd.f32 1.0, %v2971_v61  ;;  %2996 = vrcp.f32 %v547_v22  ;;  %v549_v43 = vadd.f32 1e-07, %v485_v50  ;;  %v3971_v31 = vadd.f32 1e-07, %v489_v23  ;;  %v1432_v23 = vld [vmem:[%s3653_s9 + $0xd8] sm:$0xff] }
 0x11f   : > { %v2973_v3 = vpop.eup %2972  ;;  %2998 = vrcp.f32 %v1238_v2  ;;  %v487_v52 = vsub.f32 1.0, %v3968_v30 }
 0x120   : > { %v2975_v1 = vpop.eup %2974  ;;  %3000 = vrcp.f32 %v1242_v55  ;;  %v1240_v54 = vadd.f32 1.0, %v2973_v3  ;;  %v1430_v3 = vld [vmem:[%s3653_s9 + $0xc8] sm:$0xff] }
 0x121   : > { %v2977_v8 = vpop.eup %2976  ;;  %v1244_v11 = vadd.f32 1.0, %v2975_v1  ;;  %3002 = vlog2.f32 %v643_v44 }
 0x122   : > { %v2979_v14 = vpop.eup %2978  ;;  %3004 = vrcp.f32 %v1240_v54  ;;  %v1237_v16 = vadd.f32 1.0, %v2977_v8  ;;  %v1434_v8 = vld [vmem:[%s3653_s9 + $0xe8] sm:$0xff] }
 0x123   : > { %v2981_v15 = vpop.eup %2980  ;;  %3006 = vrcp.f32 %v1244_v11  ;;  %v1241_v20 = vadd.f32 1.0, %v2979_v14 }
 0x124   : > { %v2983_v25 = vpop.eup %2982  ;;  %3008 = vrcp.f32 %v1237_v16  ;;  %v753_v26 = vmul.f32 0.6931472, %v2981_v15 }
 0x125   : > { %v2985_v24 = vpop.eup %2984  ;;  %v1486_v34 = vmul.f32 %v2983_v25, %v3806_v37  ;;  %3010 = vrcp.f32 %v1241_v20 }
 0x126   : > { %v2987_v48 = vpop.eup %2986  ;;  %v761_v36 = vmul.f32 0.6931472, %v2985_v24  ;;  %v854_v38 = vmul.f32 10.0, %v753_v26  ;;  %3012 = vrcp.f32 %v540_v13 }
 0x127   : > { %v2989_v40 = vpop.eup %2988  ;;  %v1490_v45 = vmul.f32 %v2987_v48, %v3806_v37  ;;  %v1550_v62 = vmul.f32 %v1486_v34, %v1421_v19  ;;  %3014 = vrcp.f32 %v544_v21 }
 0x128   : > { %v2991_v32 = vpop.eup %2990  ;;  %v858_v46 = vmul.f32 10.0, %v761_v36  ;;  %v919_v10 = vadd.f32 %v3768_v42, %v854_v38  ;;  %v767_v49 = vmul.f32 0.6931472, %v2989_v40  ;;  %3016 = vrcp.f32 %v542_v29  ;;  %v1429_v36 = vld [vmem:[%s3653_s9 + $0xc0] sm:$0xff]  ;;  %v3993_v40 = vld [vmem:[%s3660_s12 + $0x178] sm:$0xff] }
 0x129   : > { %v2993_v39 = vpop.eup %2992  ;;  %v1554_v17 = vmul.f32 %v1490_v45, %v1425_v56  ;;  %v775_v18 = vmul.f32 0.6931472, %v2991_v32  ;;  %3018 = vrcp.f32 %v546_v33  ;;  %v1436_v56 = vld [vmem:[%s3653_s9 + $0xf8] sm:$0xff] }
 0x12a   : > { %v2995_v22 = vpop.eup %2994  ;;  %v1488_v59 = vmul.f32 %v2993_v39, %v3806_v37  ;;  %v923_v53 = vadd.f32 %v3768_v42, %v858_v46  ;;  %v983_v28 = vsub.f32 0.0, %v919_v10  ;;  %v861_v61 = vmul.f32 10.0, %v767_v49  ;;  %v1433_v46 = vld [vmem:[%s3653_s9 + $0xe0] sm:$0xff] }
 0x12b   : > { %v2997_v2 = vpop.eup %2996  ;;  %v1606_v44 = vpack.c.bf16 %v1554_v17, %v1550_v62  ;;  %v1492_v60 = vmul.f32 %v2995_v22, %v3806_v37  ;;  %v865_v55 = vmul.f32 10.0, %v775_v18  ;;  %3020 = vrcp.f32 %v549_v43  ;;  %v4000_v18 = vld [vmem:[%s3660_s12 + $0x140] sm:$0xff] }
 0x12c   : > { %v2999_v0 = vpop.eup %2998  ;;  %v1552_v47 = vmul.f32 %v1488_v59, %v1423_v41  ;;  %v987_v6 = vsub.f32 0.0, %v923_v53  ;;  %v2462_v7 = vmul.f32 -1.442695, %v983_v28  ;;  %v926_v1 = vadd.f32 %v3768_v42, %v861_v61 }
 0x12d   : > { %v3001_v54 = vpop.eup %3000  ;;  %2079 = vmatmul.mubr.bf16.gmra.mxu0 %v1606_v44  ;;  %v1556_v63 = vmul.f32 %v1492_v60, %v1427_v57  ;;  %v1495_v11 = vmul.f32 %v2999_v0, %v3806_v37  ;;  %v930_v58 = vadd.f32 %v3768_v42, %v865_v55  ;;  %v651_v14 = vmul.f32 %v2997_v2, %v3947_v4 }
 0x12e   : > { %v3003_v16 = vpop.eup %3002  ;;  %v1499_v13 = vmul.f32 %v3001_v54, %v3806_v37  ;;  %3022 = vpow2.f32 %v2462_v7  ;;  %v2466_v50 = vmul.f32 -1.442695, %v987_v6  ;;  %v990_v15 = vsub.f32 0.0, %v926_v1 }
 0x12f   : > { %v3005_v19 = vpop.eup %3004  ;;  %v1608_v20 = vpack.c.bf16 %v1556_v63, %v1552_v47  ;;  %v1559_v21 = vmul.f32 %v1495_v11, %v1430_v3  ;;  %v994_v25 = vsub.f32 0.0, %v930_v58  ;;  %v771_v26 = vmul.f32 0.6931472, %v3003_v16  ;;  %v360_v47 = vld [vmem:[%s3660_s12 + $0x160] sm:$0xff]  ;;  %v358_v63 = vld [vmem:[%s3660_s12 + $0x150] sm:$0xff] }
 0x130   : > { %v3007_v29 = vpop.eup %3006  ;;  %v1563_v24 = vmul.f32 %v1499_v13, %v1434_v8  ;;  %v1497_v4 = vmul.f32 %v3005_v19, %v3806_v37  ;;  %3024 = vpow2.f32 %v2466_v50  ;;  %v2469_v34 = vmul.f32 -1.442695, %v990_v15  ;;  %v362_v58 = vld [vmem:[%s3660_s12 + $0x170] sm:$0xff]  ;;  %v4017_v50 = vld [vmem:[%s3660_s12 + $0x1a8] sm:$0xff] }
 0x131   : > { %v3009_v33 = vpop.eup %3008  ;;  %2192 = vmatmul.mubr.bf16.gmra.mxu1 %v1608_v20  ;;  %v1501_v48 = vmul.f32 %v3007_v29, %v3806_v37  ;;  %v2473_v38 = vmul.f32 -1.442695, %v994_v25  ;;  %3026 = vlog2.f32 %v651_v14  ;;  %v863_v43 = vmul.f32 10.0, %v771_v26  ;;  %v365_v14 = vld [vmem:[%s3660_s12 + $0x188] sm:$0xff] }
 0x132   : > { %v3011_v45 = vpop.eup %3010  ;;  %v1611_v62 = vpack.c.bf16 %v1563_v24, %v1559_v21  ;;  %v1561_v32 = vmul.f32 %v1497_v4, %v1432_v23  ;;  %v1494_v10 = vmul.f32 %v3009_v33, %v3806_v37  ;;  %3028 = vpow2.f32 %v2469_v34 }
 0x133   : > { %v3013_v49 = vpop.eup %3012  ;;  %v1565_v39 = vmul.f32 %v1501_v48, %v1436_v56  ;;  %v1498_v17 = vmul.f32 %v3011_v45, %v3806_v37  ;;  %3030 = vpow2.f32 %v2473_v38  ;;  %v928_v41 = vadd.f32 %v3768_v42, %v863_v43 }
 0x134   : > { %v3015_v22 = vpop.eup %3014  ;;  %2088 = vmatprep.mubr.bf16.mxu0 %v1611_v62  ;;  %v1558_v57 = vmul.f32 %v1494_v10, %v1429_v36  ;;  %v637_v59 = vmul.f32 %v3013_v49, %v3949_v5  ;;  %3032 = vrcp.f32 %v3971_v31  ;;  %v491_v53 = vsub.f32 1.0, %v3993_v40 }
 0x135   : > { %v3017_v28 = vpop.eup %3016  ;;  %v1613_v61 = vpack.c.bf16 %v1565_v39, %v1561_v32  ;;  %v1562_v2 = vmul.f32 %v1498_v17, %v1433_v46  ;;  %v992_v44 = vsub.f32 0.0, %v928_v41  ;;  %v645_v60 = vmul.f32 %v3015_v22, %v3952_v51 }
 0x136   : > { %v3019_v55 = vpop.eup %3018  ;;  %3034 = vlog2.f32 %v637_v59  ;;  %v641_v0 = vmul.f32 %v3017_v28, %v3957_v12  ;;  %v484_v3 = vsub.f32 1.0, %v4000_v18  ;;  %v551_v51 = vadd.f32 1e-07, %v487_v52 }
 0x137   : > { %2201 = vmatprep.mubr.bf16.mxu1 %v1613_v61  ;;  %v1610_v5 = vpack.c.bf16 %v1562_v2, %v1558_v57  ;;  %v2471_v6 = vmul.f32 -1.442695, %v992_v44  ;;  %3036 = vlog2.f32 %v645_v60  ;;  %v649_v31 = vmul.f32 %v3019_v55, %v3961_v27 }
 0x138   : > { %v3021_v7 = vpop.eup %3020  ;;  %3038 = vlog2.f32 %v641_v0  ;;  %v555_v1 = vadd.f32 1e-07, %v491_v53  ;;  %v488_v54 = vsub.f32 1.0, %v360_v47  ;;  %v548_v11 = vadd.f32 1e-07, %v484_v3 }
 0x139   : > { %2089 = vmatmul.mubr.bf16.gmra.mxu0 %v1610_v5  ;;  %3040 = vpow2.f32 %v2471_v6  ;;  %v655_v12 = vmul.f32 %v3021_v7, %v3965_v35  ;;  %v486_v52 = vsub.f32 1.0, %v358_v63  ;;  %v425_v19 = vadd.f32 1e-07, %v3955_v9 }
 0x13a   : > { %3042 = vlog2.f32 %v649_v31  ;;  %v552_v13 = vadd.f32 1e-07, %v488_v54  ;;  %v490_v20 = vsub.f32 1.0, %v362_v58  ;;  %v493_v25 = vsub.f32 1.0, %v365_v14  ;;  %v1431_v54 = vld [vmem:[%s3653_s9 + $0xd0] sm:$0xff] }
 0x13b   : > { %v3023_v8 = vpop.eup %3022  ;;  %3044 = vlog2.f32 %v655_v12  ;;  %v423_v24 = vadd.f32 1e-07, %v3968_v30  ;;  %v497_v56 = vsub.f32 1.0, %v4017_v50  ;;  %v550_v48 = vadd.f32 1e-07, %v486_v52 }
 0x13c   : > { %v1239_v27 = vadd.f32 1.0, %v3023_v8  ;;  %3046 = vrcp.f32 %v551_v51  ;;  %v427_v9 = vadd.f32 1e-07, %v3993_v40  ;;  %v554_v38 = vadd.f32 1e-07, %v490_v20 }
 0x13d   : > { %v3025_v16 = vpop.eup %3024  ;;  %3048 = vrcp.f32 %v555_v1  ;;  %v4025_v62 = vadd.f32 1e-07, %v4000_v18  ;;  %v557_v30 = vadd.f32 1e-07, %v493_v25  ;;  %v4027_v10 = vadd.f32 1e-07, %v360_v47 }
 0x13e   : > { %v3027_v15 = vpop.eup %3026  ;;  %v1243_v35 = vadd.f32 1.0, %v3025_v16  ;;  %3050 = vrcp.f32 %v1239_v27  ;;  %v561_v49 = vadd.f32 1e-07, %v497_v56  ;;  %v4029_v22 = vadd.f32 1e-07, %v358_v63  ;;  %v1438_v56 = vld [vmem:[%s3653_s9 + $0x108] sm:$0xff] }
 0x13f   : > { %v3029_v21 = vpop.eup %3028  ;;  %v779_v23 = vmul.f32 0.6931472, %v3027_v15  ;;  %3052 = vrcp.f32 %v548_v11  ;;  %v4031_v53 = vadd.f32 1e-07, %v362_v58  ;;  %v4035_v6 = vadd.f32 1e-07, %v365_v14 }
 0x140   : > { %v3031_v26 = vpop.eup %3030  ;;  %3054 = vrcp.f32 %v1243_v35  ;;  %v1246_v29 = vadd.f32 1.0, %v3029_v21  ;;  %v1435_v35 = vld [vmem:[%s3653_s9 + $0xf0] sm:$0xff]  ;;  %v433_v21 = vadd.f32 1e-07, %v4017_v50 }
 0x141   : > { %v3033_v4 = vpop.eup %3032  ;;  %v1250_v34 = vadd.f32 1.0, %v3031_v26  ;;  %v867_v33 = vmul.f32 10.0, %v779_v23  ;;  %3056 = vrcp.f32 %v552_v13 }
 0x142   : > { %3058 = vrcp.f32 %v1246_v29  ;;  %v663_v36 = vmul.f32 %v3033_v4, %v425_v19 }
 0x143   : > { %v3035_v43 = vpop.eup %3034  ;;  %3060 = vrcp.f32 %v1250_v34  ;;  %v932_v45 = vadd.f32 %v3768_v42, %v867_v33 }
 0x144   : > { %v3037_v32 = vpop.eup %3036  ;;  %v765_v46 = vmul.f32 0.6931472, %v3035_v43  ;;  %3062 = vlog2.f32 %v663_v36  ;;  %v367_v43 = vld [vmem:[%s3660_s12 + $0x198] sm:$0xff] }
 0x145   : > { %v3039_v39 = vpop.eup %3038  ;;  %v996_v17 = vsub.f32 0.0, %v932_v45  ;;  %v773_v41 = vmul.f32 0.6931472, %v3037_v32  ;;  %3064 = vrcp.f32 %v550_v48 }
 0x146   : > { %v3041_v40 = vpop.eup %3040  ;;  %v860_v57 = vmul.f32 10.0, %v765_v46  ;;  %v769_v59 = vmul.f32 0.6931472, %v3039_v39  ;;  %3066 = vrcp.f32 %v554_v38 }
 0x147   : > { %v3043_v18 = vpop.eup %3042  ;;  %v2475_v28 = vmul.f32 -1.442695, %v996_v17  ;;  %v1248_v61 = vadd.f32 1.0, %v3041_v40  ;;  %v864_v2 = vmul.f32 10.0, %v773_v41  ;;  %3068 = vrcp.f32 %v557_v30  ;;  %v371_v41 = vld [vmem:[%s3660_s12 + $0x1b8] sm:$0xff] }
 0x148   : > { %v3045_v44 = vpop.eup %3044  ;;  %v925_v60 = vadd.f32 %v3768_v42, %v860_v57  ;;  %v777_v55 = vmul.f32 0.6931472, %v3043_v18  ;;  %v862_v0 = vmul.f32 10.0, %v769_v59  ;;  %3070 = vrcp.f32 %v561_v49 }
 0x149   : > { %v3047_v47 = vpop.eup %3046  ;;  %3072 = vpow2.f32 %v2475_v28  ;;  %v929_v3 = vadd.f32 %v3768_v42, %v864_v2  ;;  %v783_v5 = vmul.f32 0.6931472, %v3045_v44  ;;  %v495_v18 = vsub.f32 1.0, %v367_v43 }
 0x14a   : > { %v3049_v31 = vpop.eup %3048  ;;  %3074 = vrcp.f32 %v1248_v61  ;;  %v989_v7 = vsub.f32 0.0, %v925_v60  ;;  %v866_v51 = vmul.f32 10.0, %v777_v55  ;;  %v927_v12 = vadd.f32 %v3768_v42, %v862_v0  ;;  %v364_v0 = vld [vmem:[%s3660_s12 + $0x180] sm:$0xff] }
 0x14b   : > { %v3051_v1 = vpop.eup %3050  ;;  %v993_v63 = vsub.f32 0.0, %v929_v3  ;;  %v869_v8 = vmul.f32 10.0, %v783_v5  ;;  %v659_v11 = vmul.f32 %v3047_v47, %v423_v24  ;;  %v667_v58 = vmul.f32 %v3049_v31, %v427_v9  ;;  %v1442_v9 = vld [vmem:[%s3653_s9 + $0x128] sm:$0xff] }
 0x14c   : > { %v3053_v27 = vpop.eup %3052  ;;  %v1496_v16 = vmul.f32 %v3051_v1, %v3806_v37  ;;  %v2468_v13 = vmul.f32 -1.442695, %v989_v7  ;;  %v931_v14 = vadd.f32 %v3768_v42, %v866_v51  ;;  %v991_v52 = vsub.f32 0.0, %v927_v12 }
 0x14d   : > { %v3055_v15 = vpop.eup %3054  ;;  %v2472_v19 = vmul.f32 -1.442695, %v993_v63  ;;  %v934_v20 = vadd.f32 %v3768_v42, %v869_v8  ;;  %3076 = vlog2.f32 %v659_v11  ;;  %v653_v33 = vmul.f32 %v3053_v27, %v4025_v62 }
 0x14e   : > { %v3057_v23 = vpop.eup %3056  ;;  %v1500_v25 = vmul.f32 %v3055_v15, %v3806_v37  ;;  %v1560_v26 = vmul.f32 %v1496_v16, %v1431_v54  ;;  %3078 = vpow2.f32 %v2468_v13  ;;  %v995_v29 = vsub.f32 0.0, %v931_v14  ;;  %v4060_v13 = vld [vmem:[%s3660_s12 + $0x190] sm:$0xff] }
 0x14f   : > { %v3059_v24 = vpop.eup %3058  ;;  %3080 = vpow2.f32 %v2472_v19  ;;  %v2470_v4 = vmul.f32 -1.442695, %v991_v52  ;;  %v998_v34 = vsub.f32 0.0, %v934_v20  ;;  %v661_v46 = vmul.f32 %v3057_v23, %v4027_v10 }
 0x150   : > { %v3061_v48 = vpop.eup %3060  ;;  %v1564_v36 = vmul.f32 %v1500_v25, %v1435_v35  ;;  %v1503_v50 = vmul.f32 %v3059_v24, %v3806_v37  ;;  %v2474_v38 = vmul.f32 -1.442695, %v995_v29  ;;  %3082 = vlog2.f32 %v667_v58 }
 0x151   : > { %v3063_v45 = vpop.eup %3062  ;;  %v1507_v30 = vmul.f32 %v3061_v48, %v3806_v37  ;;  %3084 = vpow2.f32 %v2470_v4  ;;  %v2477_v32 = vmul.f32 -1.442695, %v998_v34  ;;  %v499_v55 = vsub.f32 1.0, %v371_v41 }
 0x152   : > { %v3065_v49 = vpop.eup %3064  ;;  %v1612_v39 = vpack.c.bf16 %v1564_v36, %v1560_v26  ;;  %v1567_v17 = vmul.f32 %v1503_v50, %v1438_v56  ;;  %3086 = vpow2.f32 %v2474_v38  ;;  %v791_v62 = vmul.f32 0.6931472, %v3063_v45 }
 0x153   : > { %v3067_v40 = vpop.eup %3066  ;;  %v1571_v57 = vmul.f32 %v1507_v30, %v1442_v9  ;;  %3088 = vpow2.f32 %v2477_v32  ;;  %v657_v59 = vmul.f32 %v3065_v49, %v4029_v22  ;;  %v559_v7 = vadd.f32 1e-07, %v495_v18 }
 0x154   : > { %v3069_v28 = vpop.eup %3068  ;;  %2202 = vmatmul.mubr.bf16.gmra.mxu1 %v1612_v39  ;;  %v873_v61 = vmul.f32 10.0, %v791_v62  ;;  %3090 = vlog2.f32 %v653_v33  ;;  %v665_v2 = vmul.f32 %v3067_v40, %v4031_v53  ;;  %v492_v53 = vsub.f32 1.0, %v364_v0 }
 0x155   : > { %v3071_v10 = vpop.eup %3070  ;;  %v1615_v44 = vpack.c.bf16 %v1571_v57, %v1567_v17  ;;  %3092 = vlog2.f32 %v661_v46  ;;  %v671_v60 = vmul.f32 %v3069_v28, %v4035_v6  ;;  %v563_v12 = vadd.f32 1e-07, %v499_v55  ;;  %v368_v6 = vld [vmem:[%s3660_s12 + $0x1a0] sm:$0xff] }
 0x156   : > { %v3073_v47 = vpop.eup %3072  ;;  %v938_v3 = vadd.f32 %v3768_v42, %v873_v61  ;;  %3094 = vlog2.f32 %v657_v59  ;;  %v679_v22 = vmul.f32 %v3071_v10, %v433_v21  ;;  %v496_v27 = vsub.f32 1.0, %v368_v6  ;;  %v1444_v10 = vld [vmem:[%s3653_s9 + $0x138] sm:$0xff] }
 0x157   : > { %v3075_v5 = vpop.eup %3074  ;;  %2098 = vmatprep.mubr.bf16.mxu0 %v1615_v44  ;;  %v1252_v31 = vadd.f32 1.0, %v3073_v47  ;;  %3096 = vlog2.f32 %v665_v2  ;;  %v556_v16 = vadd.f32 1e-07, %v492_v53  ;;  %v4062_v35 = vadd.f32 1e-07, %v367_v43  ;;  %v1440_v43 = vld [vmem:[%s3653_s9 + $0x118] sm:$0xff] }
 0x158   : > { %v1002_v51 = vsub.f32 0.0, %v938_v3  ;;  %3098 = vlog2.f32 %v671_v60  ;;  %v4064_v21 = vadd.f32 1e-07, %v371_v41  ;;  %v4066_v23 = vadd.f32 1e-07, %v364_v0 }
 0x159   : > { %3100 = vrcp.f32 %v1252_v31  ;;  %v494_v24 = vsub.f32 1.0, %v4060_v13  ;;  %v560_v33 = vadd.f32 1e-07, %v496_v27  ;;  %v1505_v36 = vmul.f32 %v3075_v5, %v3806_v37 }
 0x15a   : > { %v3077_v1 = vpop.eup %3076  ;;  %v2481_v54 = vmul.f32 -1.442695, %v1002_v51  ;;  %3102 = vlog2.f32 %v679_v22  ;;  %v4073_v32 = vadd.f32 1e-07, %v368_v6 }
 0x15b   : > { %v3079_v63 = vpop.eup %3078  ;;  %v787_v8 = vmul.f32 0.6931472, %v3077_v1  ;;  %3104 = vrcp.f32 %v559_v7  ;;  %v558_v17 = vadd.f32 1e-07, %v494_v24  ;;  %v1569_v18 = vmul.f32 %v1505_v36, %v1440_v43 }
 0x15c   : > { %v3081_v11 = vpop.eup %3080  ;;  %v1245_v58 = vadd.f32 1.0, %v3079_v63  ;;  %3106 = vpow2.f32 %v2481_v54 }
 0x15d   : > { %v3083_v14 = vpop.eup %3082  ;;  %v1249_v52 = vadd.f32 1.0, %v3081_v11  ;;  %v871_v15 = vmul.f32 10.0, %v787_v8  ;;  %3108 = vrcp.f32 %v563_v12 }
 0x15e   : > { %v3085_v19 = vpop.eup %3084  ;;  %3110 = vrcp.f32 %v1245_v58  ;;  %v795_v20 = vmul.f32 0.6931472, %v3083_v14 }
 0x15f   : > { %v3087_v25 = vpop.eup %3086  ;;  %3112 = vrcp.f32 %v1249_v52  ;;  %v1247_v26 = vadd.f32 1.0, %v3085_v19  ;;  %v936_v29 = vadd.f32 %v3768_v42, %v871_v15  ;;  %v1437_v15 = vld [vmem:[%s3653_s9 + $0x100] sm:$0xff] }
 0x160   : > { %v3089_v56 = vpop.eup %3088  ;;  %v1251_v4 = vadd.f32 1.0, %v3087_v25  ;;  %v875_v34 = vmul.f32 10.0, %v795_v20  ;;  %3114 = vrcp.f32 %v556_v16 }
 0x161   : > { %v3091_v48 = vpop.eup %3090  ;;  %3116 = vrcp.f32 %v1247_v26  ;;  %v1254_v9 = vadd.f32 1.0, %v3089_v56  ;;  %v1000_v50 = vsub.f32 0.0, %v936_v29  ;;  %v1441_v29 = vld [vmem:[%s3653_s9 + $0x120] sm:$0xff] }
 0x162   : > { %v3093_v38 = vpop.eup %3092  ;;  %3118 = vrcp.f32 %v1251_v4  ;;  %v940_v45 = vadd.f32 %v3768_v42, %v875_v34  ;;  %v781_v30 = vmul.f32 0.6931472, %v3091_v48 }
 0x163   : > { %v3095_v46 = vpop.eup %3094  ;;  %3120 = vrcp.f32 %v1254_v9  ;;  %v2479_v49 = vmul.f32 -1.442695, %v1000_v50  ;;  %v789_v39 = vmul.f32 0.6931472, %v3093_v38  ;;  %v1439_v38 = vld [vmem:[%s3653_s9 + $0x110] sm:$0xff] }
 0x164   : > { %v3097_v62 = vpop.eup %3096  ;;  %v1004_v41 = vsub.f32 0.0, %v940_v45  ;;  %v868_v40 = vmul.f32 10.0, %v781_v30  ;;  %v785_v57 = vmul.f32 0.6931472, %v3095_v46  ;;  %3122 = vrcp.f32 %v560_v33  ;;  %v370_v30 = vld [vmem:[%s3660_s12 + $0x1b0] sm:$0xff] }
 0x165   : > { %v3099_v59 = vpop.eup %3098  ;;  %3124 = vpow2.f32 %v2479_v49  ;;  %v872_v28 = vmul.f32 10.0, %v789_v39  ;;  %v793_v61 = vmul.f32 0.6931472, %v3097_v62  ;;  %v1443_v39 = vld [vmem:[%s3653_s9 + $0x130] sm:$0xff] }
 0x166   : > { %v3101_v2 = vpop.eup %3100  ;;  %v2483_v44 = vmul.f32 -1.442695, %v1004_v41  ;;  %v933_v60 = vadd.f32 %v3768_v42, %v868_v40  ;;  %v870_v55 = vmul.f32 10.0, %v785_v57  ;;  %v799_v0 = vmul.f32 0.6931472, %v3099_v59 }
 0x167   : > { %v3103_v47 = vpop.eup %3102  ;;  %v1509_v3 = vmul.f32 %v3101_v2, %v3806_v37  ;;  %v937_v22 = vadd.f32 %v3768_v42, %v872_v28  ;;  %v874_v5 = vmul.f32 10.0, %v793_v61  ;;  %3126 = vrcp.f32 %v558_v17 }
 0x168   : > { %v3105_v31 = vpop.eup %3104  ;;  %3128 = vpow2.f32 %v2483_v44  ;;  %v997_v7 = vsub.f32 0.0, %v933_v60  ;;  %v935_v51 = vadd.f32 %v3768_v42, %v870_v55  ;;  %v807_v53 = vmul.f32 0.6931472, %v3103_v47 }
 0x169   : > { %v3107_v12 = vpop.eup %3106  ;;  %v1573_v6 = vmul.f32 %v1509_v3, %v1444_v10  ;;  %v1001_v1 = vsub.f32 0.0, %v937_v22  ;;  %v939_v54 = vadd.f32 %v3768_v42, %v874_v5  ;;  %v877_v63 = vmul.f32 10.0, %v799_v0  ;;  %v377_v10 = vld [vmem:[%s3660_s12 + $0x1e8] sm:$0xff] }
 0x16a   : > { %v3109_v8 = vpop.eup %3108  ;;  %v1258_v11 = vadd.f32 1.0, %v3107_v12  ;;  %v2476_v58 = vmul.f32 -1.442695, %v997_v7  ;;  %v999_v27 = vsub.f32 0.0, %v935_v51  ;;  %v881_v16 = vmul.f32 10.0, %v807_v53  ;;  %v1446_v12 = vld [vmem:[%s3653_s9 + $0x148] sm:$0xff] }
 0x16b   : > { %v3111_v14 = vpop.eup %3110  ;;  %v1617_v52 = vpack.c.bf16 %v1573_v6, %v1569_v18  ;;  %v2480_v19 = vmul.f32 -1.442695, %v1001_v1  ;;  %v1003_v20 = vsub.f32 0.0, %v939_v54  ;;  %v942_v25 = vadd.f32 %v3768_v42, %v877_v63  ;;  %v373_v18 = vld [vmem:[%s3660_s12 + $0x1c8] sm:$0xff]  ;;  %v375_v1 = vld [vmem:[%s3660_s12 + $0x1d8] sm:$0xff] }
 0x16c   : > { %v3113_v26 = vpop.eup %3112  ;;  %v1502_v24 = vmul.f32 %v3111_v14, %v3806_v37  ;;  %3130 = vrcp.f32 %v1258_v11  ;;  %v2478_v56 = vmul.f32 -1.442695, %v999_v27  ;;  %v946_v4 = vadd.f32 %v3768_v42, %v881_v16  ;;  %v1450_v63 = vld [vmem:[%s3653_s9 + $0x168] sm:$0xff]  ;;  %v372_v14 = vld [vmem:[%s3660_s12 + $0x1c0] sm:$0xff] }
 0x16d   : > { %v3115_v34 = vpop.eup %3114  ;;  %2211 = vmatprep.mubr.bf16.mxu1 %v1617_v52  ;;  %v1506_v33 = vmul.f32 %v3113_v26, %v3806_v37  ;;  %3132 = vpow2.f32 %v2476_v58  ;;  %v2482_v48 = vmul.f32 -1.442695, %v1003_v20  ;;  %v1006_v36 = vsub.f32 0.0, %v942_v25  ;;  %v376_v25 = vld [vmem:[%s3660_s12 + $0x1e0] sm:$0xff] }
 0x16e   : > { %v3117_v9 = vpop.eup %3116  ;;  %v1566_v50 = vmul.f32 %v1502_v24, %v1437_v15  ;;  %3134 = vpow2.f32 %v2480_v19  ;;  %v1010_v43 = vsub.f32 0.0, %v946_v4  ;;  %v675_v45 = vmul.f32 %v3105_v31, %v4062_v35  ;;  %v4112_v4 = vld [vmem:[%s3660_s12 + $0x1d0] sm:$0xff] }
 0x16f   : > { %v3119_v46 = vpop.eup %3118  ;;  %v1570_v49 = vmul.f32 %v1506_v33, %v1441_v29  ;;  %v1504_v17 = vmul.f32 %v3117_v9, %v3806_v37  ;;  %3136 = vpow2.f32 %v2478_v56  ;;  %v2485_v62 = vmul.f32 -1.442695, %v1006_v36 }
 0x170   : > { %v3121_v41 = vpop.eup %3120  ;;  %v1508_v40 = vmul.f32 %v3119_v46, %v3806_v37  ;;  %3138 = vpow2.f32 %v2482_v48  ;;  %v2489_v57 = vmul.f32 -1.442695, %v1010_v43  ;;  %v683_v59 = vmul.f32 %v3109_v8, %v4064_v21  ;;  %v379_v8 = vld [vmem:[%s3660_s12 + $0x1f8] sm:$0xff] }
 0x171   : > { %v3123_v28 = vpop.eup %3122  ;;  %v1614_v61 = vpack.c.bf16 %v1570_v49, %v1566_v50  ;;  %v1568_v35 = vmul.f32 %v1504_v17, %v1439_v38  ;;  %3140 = vpow2.f32 %v2485_v62  ;;  %v498_v2 = vsub.f32 1.0, %v370_v30  ;;  %v1448_v17 = vld [vmem:[%s3653_s9 + $0x158] sm:$0xff] }
 0x172   : > { %v3125_v44 = vpop.eup %3124  ;;  %v1572_v60 = vmul.f32 %v1508_v40, %v1443_v39  ;;  %3142 = vpow2.f32 %v2489_v57  ;;  %v669_v55 = vmul.f32 %v3115_v34, %v4066_v23  ;;  %v430_v0 = vadd.f32 1e-07, %v4060_v13 }
 0x173   : > { %2099 = vmatmul.mubr.bf16.gmra.mxu0 %v1614_v61  ;;  %v1256_v47 = vadd.f32 1.0, %v3125_v44  ;;  %3144 = vlog2.f32 %v675_v45  ;;  %v677_v21 = vmul.f32 %v3123_v28, %v4073_v32  ;;  %v501_v3 = vsub.f32 1.0, %v373_v18 }
 0x174   : > { %v3127_v22 = vpop.eup %3126  ;;  %v1616_v5 = vpack.c.bf16 %v1572_v60, %v1568_v35  ;;  %3146 = vlog2.f32 %v683_v59  ;;  %v505_v31 = vsub.f32 1.0, %v377_v10  ;;  %v562_v51 = vadd.f32 1e-07, %v498_v2 }
 0x175   : > { %v3129_v7 = vpop.eup %3128  ;;  %3148 = vrcp.f32 %v1256_v47  ;;  %v1511_v13 = vmul.f32 %v3121_v41, %v3806_v37  ;;  %v673_v53 = vmul.f32 %v3127_v22, %v430_v0  ;;  %v565_v32 = vadd.f32 1e-07, %v501_v3 }
 0x176   : > { %2212 = vmatmul.mubr.bf16.gmra.mxu1 %v1616_v5  ;;  %v1260_v23 = vadd.f32 1.0, %v3129_v7  ;;  %3150 = vlog2.f32 %v669_v55  ;;  %v569_v6 = vadd.f32 1e-07, %v505_v31  ;;  %v4105_v16 = vadd.f32 1e-07, %v370_v30  ;;  %v1452_v31 = vld [vmem:[%s3653_s9 + $0x178] sm:$0xff] }
 0x177   : > { %3152 = vlog2.f32 %v677_v21  ;;  %v1575_v27 = vmul.f32 %v1511_v13, %v1446_v12  ;;  %v4108_v19 = vadd.f32 1e-07, %v373_v18  ;;  %v503_v20 = vsub.f32 1.0, %v375_v1 }
 0x178   : > { %3154 = vrcp.f32 %v1260_v23  ;;  %v507_v56 = vsub.f32 1.0, %v379_v8  ;;  %v4114_v48 = vadd.f32 1e-07, %v377_v10  ;;  %v500_v36 = vsub.f32 1.0, %v372_v14 }
 0x179   : > { %v3131_v54 = vpop.eup %3130  ;;  %3156 = vrcp.f32 %v562_v51  ;;  %v504_v43 = vsub.f32 1.0, %v376_v25  ;;  %v567_v46 = vadd.f32 1e-07, %v503_v20  ;;  %v502_v49 = vsub.f32 1.0, %v4112_v4 }
 0x17a   : > { %v3133_v11 = vpop.eup %3132  ;;  %v1515_v58 = vmul.f32 %v3131_v54, %v3806_v37  ;;  %3158 = vlog2.f32 %v673_v53  ;;  %v4118_v41 = vadd.f32 1e-07, %v375_v1  ;;  %v571_v40 = vadd.f32 1e-07, %v507_v56 }
 0x17b   : > { %v3135_v52 = vpop.eup %3134  ;;  %v1253_v15 = vadd.f32 1.0, %v3133_v11  ;;  %3160 = vrcp.f32 %v565_v32  ;;  %v4120_v18 = vadd.f32 1e-07, %v379_v8  ;;  %v564_v28 = vadd.f32 1e-07, %v500_v36  ;;  %v1449_v36 = vld [vmem:[%s3653_s9 + $0x160] sm:$0xff] }
 0x17c   : > { %v3137_v26 = vpop.eup %3136  ;;  %v1579_v29 = vmul.f32 %v1515_v58, %v1450_v63  ;;  %v1257_v24 = vadd.f32 1.0, %v3135_v52  ;;  %3162 = vrcp.f32 %v569_v6  ;;  %v4122_v2 = vadd.f32 1e-07, %v372_v14 }
 0x17d   : > { %v3139_v34 = vpop.eup %3138  ;;  %3164 = vrcp.f32 %v1253_v15  ;;  %v1255_v33 = vadd.f32 1.0, %v3137_v26  ;;  %v568_v10 = vadd.f32 1e-07, %v504_v43  ;;  %v566_v0 = vadd.f32 1e-07, %v502_v49  ;;  %v4143_v49 = vld [vmem:[%s3660_s12 + $0x1f0] sm:$0xff] }
 0x17e   : > { %v3141_v9 = vpop.eup %3140  ;;  %v1619_v50 = vpack.c.bf16 %v1579_v29, %v1575_v27  ;;  %3166 = vrcp.f32 %v1257_v24  ;;  %v1259_v38 = vadd.f32 1.0, %v3139_v34  ;;  %v4125_v22 = vadd.f32 1e-07, %v376_v25  ;;  %v1445_v24 = vld [vmem:[%s3653_s9 + $0x140] sm:$0xff] }
 0x17f   : > { %v3143_v45 = vpop.eup %3142  ;;  %3168 = vrcp.f32 %v1255_v33  ;;  %v1262_v30 = vadd.f32 1.0, %v3141_v9 }
 0x180   : > { %v3145_v39 = vpop.eup %3144  ;;  %2108 = vmatprep.mubr.bf16.mxu0 %v1619_v50  ;;  %3170 = vrcp.f32 %v1259_v38  ;;  %v1266_v62 = vadd.f32 1.0, %v3143_v45  ;;  %v1447_v45 = vld [vmem:[%s3653_s9 + $0x150] sm:$0xff] }
 0x181   : > { %v3147_v57 = vpop.eup %3146  ;;  %3172 = vrcp.f32 %v1262_v30  ;;  %v803_v59 = vmul.f32 0.6931472, %v3145_v39 }
 0x182   : > { %v3149_v61 = vpop.eup %3148  ;;  %3174 = vrcp.f32 %v1266_v62  ;;  %v811_v35 = vmul.f32 0.6931472, %v3147_v57  ;;  %v1451_v62 = vld [vmem:[%s3653_s9 + $0x170] sm:$0xff] }
 0x183   : > { %v3151_v44 = vpop.eup %3150  ;;  %v1513_v60 = vmul.f32 %v3149_v61, %v3806_v37  ;;  %v879_v55 = vmul.f32 10.0, %v803_v59  ;;  %3176 = vrcp.f32 %v567_v46  ;;  %v1454_v61 = vld [vmem:[%s3653_s9 + $0x188] sm:$0xff] }
 0x184   : > { %v3153_v47 = vpop.eup %3152  ;;  %v883_v21 = vmul.f32 10.0, %v811_v35  ;;  %v797_v3 = vmul.f32 0.6931472, %v3151_v44  ;;  %3178 = vrcp.f32 %v571_v40 }
 0x185   : > { %v3155_v5 = vpop.eup %3154  ;;  %v1577_v7 = vmul.f32 %v1513_v60, %v1448_v17  ;;  %v944_v51 = vadd.f32 %v3768_v42, %v879_v55  ;;  %v805_v13 = vmul.f32 0.6931472, %v3153_v47  ;;  %3180 = vrcp.f32 %v564_v28  ;;  %v1458_v60 = vld [vmem:[%s3653_s9 + $0x1a8] sm:$0xff] }
 0x186   : > { %v3157_v23 = vpop.eup %3156  ;;  %v1517_v53 = vmul.f32 %v3155_v5, %v3806_v37  ;;  %v948_v12 = vadd.f32 %v3768_v42, %v883_v21  ;;  %v876_v32 = vmul.f32 10.0, %v797_v3  ;;  %3182 = vrcp.f32 %v568_v10 }
 0x187   : > { %v3159_v6 = vpop.eup %3158  ;;  %v1008_v1 = vsub.f32 0.0, %v944_v51  ;;  %v880_v54 = vmul.f32 10.0, %v805_v13  ;;  %v681_v63 = vmul.f32 %v3157_v23, %v4105_v16  ;;  %3184 = vrcp.f32 %v566_v0 }
 0x188   : > { %v3161_v8 = vpop.eup %3160  ;;  %v1581_v11 = vmul.f32 %v1517_v53, %v1452_v31  ;;  %v1012_v58 = vsub.f32 0.0, %v948_v12  ;;  %v941_v27 = vadd.f32 %v3768_v42, %v876_v32  ;;  %v801_v14 = vmul.f32 0.6931472, %v3159_v6 }
 0x189   : > { %v3163_v52 = vpop.eup %3162  ;;  %v2487_v15 = vmul.f32 -1.442695, %v1008_v1  ;;  %v945_v20 = vadd.f32 %v3768_v42, %v880_v54  ;;  %3186 = vlog2.f32 %v681_v63  ;;  %v687_v25 = vmul.f32 %v3161_v8, %v4108_v19 }
 0x18a   : > { %v3165_v26 = vpop.eup %3164  ;;  %v1621_v29 = vpack.c.bf16 %v1581_v11, %v1577_v7  ;;  %v2491_v16 = vmul.f32 -1.442695, %v1012_v58  ;;  %v1005_v56 = vsub.f32 0.0, %v941_v27  ;;  %v878_v34 = vmul.f32 10.0, %v801_v14 }
 0x18b   : > { %v3167_v33 = vpop.eup %3166  ;;  %v1510_v9 = vmul.f32 %v3165_v26, %v3806_v37  ;;  %3188 = vpow2.f32 %v2487_v15  ;;  %v1009_v50 = vsub.f32 0.0, %v945_v20  ;;  %v695_v38 = vmul.f32 %v3163_v52, %v4114_v48 }
 0x18c   : > { %v3169_v43 = vpop.eup %3168  ;;  %2221 = vmatprep.mubr.bf16.mxu1 %v1621_v29  ;;  %v1514_v19 = vmul.f32 %v3167_v33, %v3806_v37  ;;  %3190 = vpow2.f32 %v2491_v16  ;;  %v2484_v30 = vmul.f32 -1.442695, %v1005_v56  ;;  %v943_v46 = vadd.f32 %v3768_v42, %v878_v34 }
 0x18d   : > { %v3171_v39 = vpop.eup %3170  ;;  %v1574_v17 = vmul.f32 %v1510_v9, %v1445_v24  ;;  %v1512_v40 = vmul.f32 %v3169_v43, %v3806_v37  ;;  %v2488_v57 = vmul.f32 -1.442695, %v1009_v50  ;;  %3192 = vlog2.f32 %v687_v25 }
 0x18e   : > { %v3173_v48 = vpop.eup %3172  ;;  %v1578_v59 = vmul.f32 %v1514_v19, %v1449_v36  ;;  %v1516_v28 = vmul.f32 %v3171_v39, %v3806_v37  ;;  %3194 = vpow2.f32 %v2484_v30  ;;  %v1007_v35 = vsub.f32 0.0, %v943_v46  ;;  %v1694_v30 = vld [vmem:[%s4326_s4] sm:$0x3] }
 0x18f   : > { %v3175_v10 = vpop.eup %3174  ;;  %v1576_v44 = vmul.f32 %v1512_v40, %v1447_v45  ;;  %v1519_v55 = vmul.f32 %v3173_v48, %v3806_v37  ;;  %3196 = vpow2.f32 %v2488_v57  ;;  %v506_v0 = vsub.f32 1.0, %v4143_v49 }
 0x190   : > { %v3177_v47 = vpop.eup %3176  ;;  %v1618_v21 = vpack.c.bf16 %v1578_v59, %v1574_v17  ;;  %v1580_v3 = vmul.f32 %v1516_v28, %v1451_v62  ;;  %v1523_v5 = vmul.f32 %v3175_v10, %v3806_v37  ;;  %v2486_v31 = vmul.f32 -1.442695, %v1007_v35 }
 0x191   : > { %v3179_v7 = vpop.eup %3178  ;;  %v1583_v51 = vmul.f32 %v1519_v55, %v1454_v61  ;;  %3198 = vlog2.f32 %v695_v38  ;;  %v691_v13 = vmul.f32 %v3177_v47, %v4118_v41  ;;  %v438_v23 = vadd.f32 1e-07, %v4112_v4 }
 0x192   : > { %v3181_v53 = vpop.eup %3180  ;;  %2109 = vmatmul.mubr.bf16.gmra.mxu0 %v1618_v21  ;;  %v1620_v12 = vpack.c.bf16 %v1580_v3, %v1576_v44  ;;  %v1587_v32 = vmul.f32 %v1523_v5, %v1458_v60  ;;  %3200 = vpow2.f32 %v2486_v31  ;;  %v699_v6 = vmul.f32 %v3179_v7, %v4120_v18 }
 0x193   : > { %v3183_v1 = vpop.eup %3182  ;;  %3202 = vlog2.f32 %v691_v13  ;;  %v685_v54 = vmul.f32 %v3181_v53, %v4122_v2  ;;  %v570_v63 = vadd.f32 1e-07, %v506_v0  ;;  %v1696_v27 = vlaneseq }
 0x194   : > { %v3185_v8 = vpop.eup %3184  ;;  %2222 = vmatmul.mubr.bf16.gmra.mxu1 %v1620_v12  ;;  %v1623_v11 = vpack.c.bf16 %v1587_v32, %v1583_v51  ;;  %3204 = vlog2.f32 %v699_v6  ;;  %v693_v41 = vmul.f32 %v3183_v1, %v4125_v22  ;;  %v442_v61 = vadd.f32 1e-07, %v4143_v49 }
 0x195   : > { %3206 = vlog2.f32 %v685_v54  ;;  %v689_v4 = vmul.f32 %v3185_v8, %v438_v23  ;;  %v1697_v26 = vshrl.u32 %v1696_v27, 7 }
 0x196   : > { %v3187_v58 = vpop.eup %3186  ;;  %2118 = vmatprep.mubr.bf16.mxu0 %v1623_v11  ;;  %3208 = vlog2.f32 %v693_v41 }
 0x197   : > { %v809_v14 = vmul.f32 0.6931472, %v3187_v58  ;;  %3210 = vrcp.f32 %v570_v63  ;;  %v1698_v50 = vsub.s32 0, %v1697_v26  ;;  %v1702_v17 = vsub.s32 1, %v1697_v26 }
 0x198   : > { %v3189_v18 = vpop.eup %3188  ;;  %3212 = vlog2.f32 %v689_v4  ;;  %v1456_v4 = vld [vmem:[%s3653_s9 + $0x198] sm:$0xff] }
 0x199   : > { %v3191_v52 = vpop.eup %3190  ;;  %v1264_v15 = vadd.f32 1.0, %v3189_v18  ;;  %v882_v2 = vmul.f32 10.0, %v809_v14  ;;  %v4164_v35 = vrot.slane %v1694_v30, %v1698_v50  ;;  %v4167_v31 = vrot.slane %v1694_v30, %v1702_v17 }
 0x19a   : > { %v3193_v20 = vpop.eup %3192  ;;  %v1268_v25 = vadd.f32 1.0, %v3191_v52  ;;  %v1460_v52 = vld [vmem:[%s3653_s9 + $0x1b8] sm:$0xff] }
 0x19b   : > { %v3195_v29 = vpop.eup %3194  ;;  %3214 = vrcp.f32 %v1264_v15  ;;  %v947_v22 = vadd.f32 %v3768_v42, %v882_v2  ;;  %v815_v24 = vmul.f32 0.6931472, %v3193_v20 }
 0x19c   : > { %v3197_v16 = vpop.eup %3196  ;;  %3216 = vrcp.f32 %v1268_v25  ;;  %v1261_v56 = vadd.f32 1.0, %v3195_v29 }
 0x19d   : > { %v1265_v34 = vadd.f32 1.0, %v3197_v16  ;;  %v1011_v33 = vsub.f32 0.0, %v947_v22  ;;  %v885_v36 = vmul.f32 10.0, %v815_v24 }
 0x19e   : > { %v3199_v9 = vpop.eup %3198  ;;  %3218 = vrcp.f32 %v1261_v56 }
 0x19f   : > { %v3201_v38 = vpop.eup %3200  ;;  %3220 = vrcp.f32 %v1265_v34  ;;  %v2490_v43 = vmul.f32 -1.442695, %v1011_v33  ;;  %v823_v19 = vmul.f32 0.6931472, %v3199_v9  ;;  %v950_v45 = vadd.f32 %v3768_v42, %v885_v36  ;;  %v1453_v33 = vld [vmem:[%s3653_s9 + $0x180] sm:$0xff] }
 0x1a0   : > { %v3203_v46 = vpop.eup %3202  ;;  %v1263_v39 = vadd.f32 1.0, %v3201_v38 }
 0x1a1   : > { %v3205_v62 = vpop.eup %3204  ;;  %3222 = vpow2.f32 %v2490_v43  ;;  %v889_v40 = vmul.f32 10.0, %v823_v19  ;;  %v1014_v57 = vsub.f32 0.0, %v950_v45  ;;  %v819_v48 = vmul.f32 0.6931472, %v3203_v46  ;;  %v1457_v43 = vld [vmem:[%s3653_s9 + $0x1a0] sm:$0xff] }
 0x1a2   : > { %v3207_v59 = vpop.eup %3206  ;;  %v827_v28 = vmul.f32 0.6931472, %v3205_v62  ;;  %3224 = vrcp.f32 %v1263_v39 }
 0x1a3   : > { %v3209_v10 = vpop.eup %3208  ;;  %v954_v44 = vadd.f32 %v3768_v42, %v889_v40  ;;  %v2493_v60 = vmul.f32 -1.442695, %v1014_v57  ;;  %v887_v55 = vmul.f32 10.0, %v819_v48  ;;  %v813_v0 = vmul.f32 0.6931472, %v3207_v59 }
 0x1a4   : > { %v3211_v47 = vpop.eup %3210  ;;  %v891_v21 = vmul.f32 10.0, %v827_v28  ;;  %v821_v3 = vmul.f32 0.6931472, %v3209_v10  ;;  %v2060_v5 = vpop.f32.mrf.mxu0 }
 0x1a5   : > { %v3213_v7 = vpop.eup %3212  ;;  %v1018_v51 = vsub.f32 0.0, %v954_v44  ;;  %3226 = vpow2.f32 %v2493_v60  ;;  %v952_v49 = vadd.f32 %v3768_v42, %v887_v55  ;;  %v884_v13 = vmul.f32 10.0, %v813_v0 }
 0x1a6   : > { %v956_v23 = vadd.f32 %v3768_v42, %v891_v21  ;;  %v888_v53 = vmul.f32 10.0, %v821_v3  ;;  %v697_v12 = vmul.f32 %v3211_v47, %v442_v61  ;;  %v817_v32 = vmul.f32 0.6931472, %v3213_v7  ;;  %v2173_v6 = vpop.f32.mrf.mxu1  ;;  %v2062_v1 = vpop.f32.mrf.mxu0 }
 0x1a7   : > { %v2497_v54 = vmul.f32 -1.442695, %v1018_v51  ;;  %v1016_v63 = vsub.f32 0.0, %v952_v49  ;;  %v949_v8 = vadd.f32 %v3768_v42, %v884_v13  ;;  %v2061_v11 = vadd.f32 %v2060_v5, %v4164_v35 }
 0x1a8   : > { %v3215_v41 = vpop.eup %3214  ;;  %v1020_v58 = vsub.f32 0.0, %v956_v23  ;;  %v953_v27 = vadd.f32 %v3768_v42, %v888_v53  ;;  %3228 = vlog2.f32 %v697_v12  ;;  %v886_v14 = vmul.f32 10.0, %v817_v32  ;;  %v2175_v25 = vpop.f32.mrf.mxu1 }
 0x1a9   : > { %v3217_v18 = vpop.eup %3216  ;;  %v1521_v15 = vmul.f32 %v3215_v41, %v3806_v37  ;;  %3230 = vpow2.f32 %v2497_v54  ;;  %v2495_v2 = vmul.f32 -1.442695, %v1016_v63  ;;  %v1013_v20 = vsub.f32 0.0, %v949_v8  ;;  %v2064_v26 = vpop.f32.mrf.mxu0 }
 0x1aa   : > { %v1525_v29 = vmul.f32 %v3217_v18, %v3806_v37  ;;  %v2499_v22 = vmul.f32 -1.442695, %v1020_v58  ;;  %v1017_v24 = vsub.f32 0.0, %v953_v27  ;;  %v951_v16 = vadd.f32 %v3768_v42, %v886_v14  ;;  %v2177_v17 = vpop.f32.mrf.mxu1  ;;  %v1455_v27 = vld [vmem:[%s3653_s9 + $0x190] sm:$0xff] }
 0x1ab   : > { %v3219_v56 = vpop.eup %3218  ;;  %v1585_v34 = vmul.f32 %v1521_v15, %v1456_v4  ;;  %3232 = vpow2.f32 %v2495_v2  ;;  %v2492_v36 = vmul.f32 -1.442695, %v1013_v20  ;;  %v2174_v9 = vadd.f32 %v2173_v6, %v2061_v11  ;;  %v2066_v62 = vpop.f32.mrf.mxu0  ;;  %v1459_v2 = vld [vmem:[%s3653_s9 + $0x1b0] sm:$0xff] }
 0x1ac   : > { %v3221_v50 = vpop.eup %3220  ;;  %v1589_v38 = vmul.f32 %v1525_v29, %v1460_v52  ;;  %v1518_v19 = vmul.f32 %v3219_v56, %v3806_v37  ;;  %3234 = vpow2.f32 %v2499_v22  ;;  %v2496_v45 = vmul.f32 -1.442695, %v1017_v24  ;;  %v2179_v47 = vpop.f32.mrf.mxu1 }
 0x1ad   : > { %v1522_v30 = vmul.f32 %v3221_v50, %v3806_v37  ;;  %3236 = vpow2.f32 %v2492_v36  ;;  %v1015_v46 = vsub.f32 0.0, %v951_v16  ;;  %2252 = vst [vmem:[%s4186_s11] sm:$0xff] %v2174_v9  ;;  %v2063_v39 = vadd.f32 %v2062_v1, %v4167_v31 }
 0x1ae   : > { %v3223_v40 = vpop.eup %3222  ;;  %v1625_v57 = vpack.c.bf16 %v1589_v38, %v1585_v34  ;;  %v1582_v48 = vmul.f32 %v1518_v19, %v1453_v33  ;;  %3238 = vpow2.f32 %v2496_v45  ;;  %v2065_v59 = vadd.f32 %v2064_v26, %v4164_v35 }
 0x1af   : > { %v1586_v28 = vmul.f32 %v1522_v30, %v1457_v43  ;;  %v1267_v61 = vadd.f32 1.0, %v3223_v40  ;;  %v2176_v10 = vadd.f32 %v2175_v25, %v2063_v39  ;;  %v2067_v60 = vadd.f32 %v2066_v62, %v4167_v31  ;;  %v3225_v55 = vpop.eup %3224  ;;  %v1462_v43 = vld [vmem:[%s3653_s9 + $0x1c8] sm:$0xff] }
 0x1b0   : > { %2231 = vmatprep.mubr.bf16.mxu1 %v1625_v57  ;;  %v2178_v44 = vadd.f32 %v2177_v17, %v2065_v59  ;;  %v2494_v3 = vmul.f32 -1.442695, %v1015_v46  ;;  %v1520_v4 = vmul.f32 %v3225_v55, %v3806_v37  ;;  %v1466_v39 = vld [vmem:[%s3653_s9 + $0x1e8] sm:$0xff] }
 0x1b1   : > { %v1622_v0 = vpack.c.bf16 %v1586_v28, %v1582_v48  ;;  %3240 = vrcp.f32 %v1267_v61  ;;  %2253 = vst [vmem:[%s4186_s11 + $0x8] sm:$0xff] %v2176_v10  ;;  %v2180_v5 = vadd.f32 %v2179_v47, %v2067_v60  ;;  %v1464_v28 = vld [vmem:[%s3653_s9 + $0x1d8] sm:$0xff] }
 0x1b2   : > { %v3227_v21 = vpop.eup %3226  ;;  %2254 = vst [vmem:[%s4186_s11 + $0x10] sm:$0xff] %v2178_v44  ;;  %v1584_v26 = vmul.f32 %v1520_v4, %v1455_v27  ;;  %v1468_v60 = vld [vmem:[%s3653_s9 + $0x1f8] sm:$0xff]  ;;  %v1467_v4 = vld [vmem:[%s3653_s9 + $0x1f0] sm:$0xff] }
 0x1b3   : > { %2119 = vmatmul.mubr.bf16.gmra.mxu0 %v1622_v0  ;;  %v1270_v7 = vadd.f32 1.0, %v3227_v21  ;;  %2255 = vst [vmem:[%s4186_s11 + $0x18] sm:$0xff] %v2180_v5  ;;  %v1461_v21 = vld [vmem:[%s3653_s9 + $0x1c0] sm:$0xff] }
 0x1b5   : > { %v3229_v51 = vpop.eup %3228  ;;  %3242 = vrcp.f32 %v1270_v7 }
 0x1b6   : > { %v3231_v49 = vpop.eup %3230  ;;  %v825_v13 = vmul.f32 0.6931472, %v3229_v51  ;;  %3244 = vpow2.f32 %v2494_v3  ;;  %v1465_v51 = vld [vmem:[%s3653_s9 + $0x1e0] sm:$0xff] }
 0x1b7   : > { %v1274_v23 = vadd.f32 1.0, %v3231_v49 }
 0x1b8   : > { %v3233_v53 = vpop.eup %3232  ;;  %v890_v12 = vmul.f32 10.0, %v825_v13  ;;  %v2070_v32 = vpop.f32.mrf.mxu0 }
 0x1b9   : > { %v3235_v6 = vpop.eup %3234  ;;  %3246 = vrcp.f32 %v1274_v23  ;;  %v1272_v1 = vadd.f32 1.0, %v3233_v53  ;;  %v2071_v25 = vadd.f32 %v2070_v32, %v4164_v35 }
 0x1ba   : > { %v3237_v54 = vpop.eup %3236  ;;  %v1276_v63 = vadd.f32 1.0, %v3235_v6  ;;  %v955_v8 = vadd.f32 %v3768_v42, %v890_v12  ;;  %v2072_v11 = vpop.f32.mrf.mxu0 }
 0x1bb   : > { %v3239_v41 = vpop.eup %3238  ;;  %3248 = vrcp.f32 %v1272_v1  ;;  %v1269_v58 = vadd.f32 1.0, %v3237_v54  ;;  %v2073_v29 = vadd.f32 %v2072_v11, %v4167_v31  ;;  %v1463_v11 = vld [vmem:[%s3653_s9 + $0x1d0] sm:$0xff]  ;;  %s3359_s9 = sshll.u32 %s3441_s7, 4  ;;  %s3360_s9 = int_to_ptr.vmem [resolvable:$false] %s3359_s9 }
 0x1bc   : > { %3250 = vrcp.f32 %v1276_v63  ;;  %v1273_v14 = vadd.f32 1.0, %v3239_v41  ;;  %v1019_v18 = vsub.f32 0.0, %v955_v8  ;;  %v2074_v52 = vpop.f32.mrf.mxu0  ;;  %s3361_s0 = scalar_lea.vmem %s3360_s9, 8192  ;;  %p3362_p2 = scmp.lt.s32.totalorder %s4277_s27, %s3360_s9 }
 0x1bd   : > { %3252 = vrcp.f32 %v1269_v58  ;;  %v2075_v33 = vadd.f32 %v2074_v52, %v4164_v35  ;;  %p3363_p10 = scmp.lt.s32.totalorder %s3361_s0, %s3355_s22 }
 0x1be   : > { %v3241_v15 = vpop.eup %3240  ;;  %3254 = vrcp.f32 %v1273_v14  ;;  %v2498_v20 = vmul.f32 -1.442695, %v1019_v18  ;;  %v2076_v16 = vpop.f32.mrf.mxu0 }
 0x1bf   : > { %v1524_v42 = vmul.f32 %v3241_v15, %v3806_v37  ;;  %v2077_v45 = vadd.f32 %v2076_v16, %v4167_v31  ;;  %p3364_p1 = por %p3363_p10, %p3362_p2 }
 0x1c0   : > { %3256 = vpow2.f32 %v2498_v20 }
 0x1c1   : > { %v1588_v22 = vmul.f32 %v1524_v42, %v1459_v2  ;;  %v2183_v24 = vpop.f32.mrf.mxu1  ;;  %p3365_p4 = pnand %p3364_p1, %p3358_p5 }
 0x1c2   : > { %v3243_v56 = vpop.eup %3242  ;;  %v2184_v34 = vadd.f32 %v2183_v24, %v2071_v25 }
 0x1c3   : > { %v3245_v36 = vpop.eup %3244  ;;  %v1624_v9 = vpack.c.bf16 %v1588_v22, %v1584_v26  ;;  %v1527_v50 = vmul.f32 %v3243_v56, %v3806_v37  ;;  %v2185_v38 = vpop.f32.mrf.mxu1 }
 0x1c4   : > { %2256 = vst [vmem:[%s4186_s11 + $0x20] sm:$0xff] %v2184_v34  ;;  %v2186_v19 = vadd.f32 %v2185_v38, %v2073_v29  ;;  %v1271_v17 = vadd.f32 1.0, %v3245_v36 }
 0x1c5   : > { %2232 = vmatmul.mubr.bf16.gmra.mxu1 %v1624_v9  ;;  %v2187_v30 = vpop.f32.mrf.mxu1  ;;  %v1591_v57 = vmul.f32 %v1527_v50, %v1462_v43 }
 0x1c6   : > { %v3247_v46 = vpop.eup %3246  ;;  %2257 = vst [vmem:[%s4186_s11 + $0x28] sm:$0xff] %v2186_v19  ;;  %v2188_v62 = vadd.f32 %v2187_v30, %v2075_v33  ;;  %3258 = vrcp.f32 %v1271_v17 }
 0x1c7   : > { %v1531_v40 = vmul.f32 %v3247_v46, %v3806_v37  ;;  %v2189_v48 = vpop.f32.mrf.mxu1 }
 0x1c8   : > { %v3249_v59 = vpop.eup %3248  ;;  %2258 = vst [vmem:[%s4186_s11 + $0x30] sm:$0xff] %v2188_v62  ;;  %v2190_v61 = vadd.f32 %v2189_v48, %v2077_v45 }
 0x1c9   : > { %v3251_v10 = vpop.eup %3250  ;;  %v1595_v44 = vmul.f32 %v1531_v40, %v1466_v39  ;;  %v1529_v55 = vmul.f32 %v3249_v59, %v3806_v37 }
 0x1ca   : > { %v3253_v0 = vpop.eup %3252  ;;  %v1533_v47 = vmul.f32 %v3251_v10, %v3806_v37  ;;  %2259 = vst [vmem:[%s4186_s11 + $0x38] sm:$0xff] %v2190_v61 }
 0x1cb   : > { %v3255_v3 = vpop.eup %3254  ;;  %v1627_v5 = vpack.c.bf16 %v1595_v44, %v1591_v57  ;;  %v1593_v7 = vmul.f32 %v1529_v55, %v1464_v28  ;;  %v1526_v49 = vmul.f32 %v3253_v0, %v3806_v37 }
 0x1cc   : > { %v1597_v13 = vmul.f32 %v1533_v47, %v1468_v60  ;;  %v1530_v23 = vmul.f32 %v3255_v3, %v3806_v37 }
 0x1cd   : > { %v3257_v53 = vpop.eup %3256  ;;  %2128 = vmatprep.mubr.bf16.mxu0 %v1627_v5  ;;  %v1590_v12 = vmul.f32 %v1526_v49, %v1461_v21 }
 0x1ce   : > { %v1629_v32 = vpack.c.bf16 %v1597_v13, %v1593_v7  ;;  %v1594_v6 = vmul.f32 %v1530_v23, %v1465_v51  ;;  %v1275_v1 = vadd.f32 1.0, %v3257_v53 }
 0x1d0   : > { %2241 = vmatprep.mubr.bf16.mxu1 %v1629_v32  ;;  %v1626_v54 = vpack.c.bf16 %v1594_v6, %v1590_v12  ;;  %3260 = vrcp.f32 %v1275_v1 }
 0x1d2   : > { %2129 = vmatmul.mubr.bf16.gmra.mxu0 %v1626_v54 }
 0x1d3   : > { %v3259_v63 = vpop.eup %3258 }
 0x1d4   : > { %v1528_v8 = vmul.f32 %v3259_v63, %v3806_v37 }
 0x1d6   : > { %v1592_v27 = vmul.f32 %v1528_v8, %v1463_v11 }
 0x1dd   : > { %v3261_v41 = vpop.eup %3260 }
 0x1de   : > { %v1532_v58 = vmul.f32 %v3261_v41, %v3806_v37 }
 0x1e0   : > { %v1596_v14 = vmul.f32 %v1532_v58, %v1467_v4 }
 0x1e2   : > { %v1628_v18 = vpack.c.bf16 %v1596_v14, %v1592_v27 }
 0x1e4   : > { %2242 = vmatmul.mubr.bf16.gmra.mxu1 %v1628_v18 }
 0x1ed   : > { %v2080_v52 = vpop.f32.mrf.mxu0 }
 0x1ee   : > { %v2081_v15 = vadd.f32 %v2080_v52, %v4164_v35 }
 0x1ef   : > { %v2082_v2 = vpop.f32.mrf.mxu0 }
 0x1f0   : > { %v2083_v20 = vadd.f32 %v2082_v2, %v4167_v31 }
 0x1f1   : > { %v2193_v25 = vpop.f32.mrf.mxu1  ;;  %v2084_v42 = vpop.f32.mrf.mxu0 }
 0x1f2   : > { %v2194_v26 = vadd.f32 %v2193_v25, %v2081_v15  ;;  %v2085_v29 = vadd.f32 %v2084_v42, %v4164_v35 }
 0x1f3   : > { %v2195_v22 = vpop.f32.mrf.mxu1  ;;  %v2086_v37 = vpop.f32.mrf.mxu0 }
 0x1f4   : > { %2260 = vst [vmem:[%s4186_s11 + $0x40] sm:$0xff] %v2194_v26  ;;  %v2196_v24 = vadd.f32 %v2195_v22, %v2083_v20  ;;  %v2087_v16 = vadd.f32 %v2086_v37, %v4167_v31 }
 0x1f5   : > { %v2197_v56 = vpop.f32.mrf.mxu1 }
 0x1f6   : > { %2261 = vst [vmem:[%s4186_s11 + $0x48] sm:$0xff] %v2196_v24  ;;  %v2198_v34 = vadd.f32 %v2197_v56, %v2085_v29 }
 0x1f7   : > { %v2199_v33 = vpop.f32.mrf.mxu1 }
 0x1f8   : > { %2262 = vst [vmem:[%s4186_s11 + $0x50] sm:$0xff] %v2198_v34  ;;  %v2200_v36 = vadd.f32 %v2199_v33, %v2087_v16 }
 0x1f9   : > { %v2090_v9 = vpop.f32.mrf.mxu0 }
 0x1fa   : > { %2263 = vst [vmem:[%s4186_s11 + $0x58] sm:$0xff] %v2200_v36  ;;  %v2091_v43 = vadd.f32 %v2090_v9, %v4164_v35 }
 0x1fb   : > { %v2092_v50 = vpop.f32.mrf.mxu0 }
 0x1fc   : > { %v2093_v19 = vadd.f32 %v2092_v50, %v4167_v31 }
 0x1fd   : > { %v2094_v38 = vpop.f32.mrf.mxu0 }
 0x1fe   : > { %v2095_v39 = vadd.f32 %v2094_v38, %v4164_v35 }
 0x1ff   : > { %v2096_v30 = vpop.f32.mrf.mxu0 }
 0x200   : > { %v2097_v40 = vadd.f32 %v2096_v30, %v4167_v31 }
 0x214   : > { %v2203_v45 = vpop.f32.mrf.mxu1 }
 0x215   : > { %v2204_v46 = vadd.f32 %v2203_v45, %v2091_v43 }
 0x216   : > { %v2205_v17 = vpop.f32.mrf.mxu1 }
 0x217   : > { %2264 = vst [vmem:[%s4186_s11 + $0x60] sm:$0xff] %v2204_v46  ;;  %v2206_v62 = vadd.f32 %v2205_v17, %v2093_v19 }
 0x218   : > { %v2207_v57 = vpop.f32.mrf.mxu1 }
 0x219   : > { %2265 = vst [vmem:[%s4186_s11 + $0x68] sm:$0xff] %v2206_v62  ;;  %v2208_v48 = vadd.f32 %v2207_v57, %v2095_v39 }
 0x21a   : > { %v2209_v59 = vpop.f32.mrf.mxu1 }
 0x21b   : > { %2266 = vst [vmem:[%s4186_s11 + $0x70] sm:$0xff] %v2208_v48  ;;  %v2210_v28 = vadd.f32 %v2209_v59, %v2097_v40 }
 0x21d   : > { %2267 = vst [vmem:[%s4186_s11 + $0x78] sm:$0xff] %v2210_v28 }
 0x233   : > { %v2100_v61 = vpop.f32.mrf.mxu0 }
 0x234   : > { %v2101_v10 = vadd.f32 %v2100_v61, %v4164_v35 }
 0x235   : > { %v2102_v44 = vpop.f32.mrf.mxu0 }
 0x236   : > { %v2213_v60 = vpop.f32.mrf.mxu1  ;;  %v2103_v55 = vadd.f32 %v2102_v44, %v4167_v31 }
 0x237   : > { %v2214_v0 = vadd.f32 %v2213_v60, %v2101_v10  ;;  %v2104_v47 = vpop.f32.mrf.mxu0 }
 0x238   : > { %v2215_v21 = vpop.f32.mrf.mxu1  ;;  %v2105_v3 = vadd.f32 %v2104_v47, %v4164_v35 }
 0x239   : > { %2268 = vst [vmem:[%s4186_s11 + $0x80] sm:$0xff] %v2214_v0  ;;  %v2216_v5 = vadd.f32 %v2215_v21, %v2103_v55  ;;  %v2106_v7 = vpop.f32.mrf.mxu0 }
 0x23a   : > { %v2217_v51 = vpop.f32.mrf.mxu1  ;;  %v2107_v49 = vadd.f32 %v2106_v7, %v4167_v31 }
 0x23b   : > { %2269 = vst [vmem:[%s4186_s11 + $0x88] sm:$0xff] %v2216_v5  ;;  %v2218_v13 = vadd.f32 %v2217_v51, %v2105_v3 }
 0x23c   : > { %v2219_v23 = vpop.f32.mrf.mxu1 }
 0x23d   : > { %2270 = vst [vmem:[%s4186_s11 + $0x90] sm:$0xff] %v2218_v13  ;;  %v2220_v53 = vadd.f32 %v2219_v23, %v2107_v49 }
 0x23f   : > { %2271 = vst [vmem:[%s4186_s11 + $0x98] sm:$0xff] %v2220_v53 }
 0x252   : > { %v2110_v12 = vpop.f32.mrf.mxu0 }
 0x253   : > { %v2111_v32 = vadd.f32 %v2110_v12, %v4164_v35 }
 0x254   : > { %v2223_v6 = vpop.f32.mrf.mxu1  ;;  %v2112_v1 = vpop.f32.mrf.mxu0 }
 0x255   : > { %v2224_v54 = vadd.f32 %v2223_v6, %v2111_v32  ;;  %v2113_v63 = vadd.f32 %v2112_v1, %v4167_v31 }
 0x256   : > { %v2225_v8 = vpop.f32.mrf.mxu1  ;;  %v2114_v11 = vpop.f32.mrf.mxu0 }
 0x257   : > { %2272 = vst [vmem:[%s4186_s11 + $0xa0] sm:$0xff] %v2224_v54  ;;  %v2226_v41 = vadd.f32 %v2225_v8, %v2113_v63  ;;  %v2115_v4 = vadd.f32 %v2114_v11, %v4164_v35 }
 0x258   : > { %v2227_v58 = vpop.f32.mrf.mxu1  ;;  %v2116_v27 = vpop.f32.mrf.mxu0 }
 0x259   : > { %2273 = vst [vmem:[%s4186_s11 + $0xa8] sm:$0xff] %v2226_v41  ;;  %v2228_v14 = vadd.f32 %v2227_v58, %v2115_v4  ;;  %v2117_v18 = vadd.f32 %v2116_v27, %v4167_v31 }
 0x25a   : > { %v2229_v52 = vpop.f32.mrf.mxu1 }
 0x25b   : > { %2274 = vst [vmem:[%s4186_s11 + $0xb0] sm:$0xff] %v2228_v14  ;;  %v2230_v15 = vadd.f32 %v2229_v52, %v2117_v18 }
 0x25d   : > { %2275 = vst [vmem:[%s4186_s11 + $0xb8] sm:$0xff] %v2230_v15 }
 0x273   : > { %v2120_v2 = vpop.f32.mrf.mxu0 }
 0x274   : > { %v2121_v42 = vadd.f32 %v2120_v2, %v4164_v35 }
 0x275   : > { %v2122_v20 = vpop.f32.mrf.mxu0 }
 0x276   : > { %v2123_v26 = vadd.f32 %v2122_v20, %v4167_v31 }
 0x277   : > { %v2124_v25 = vpop.f32.mrf.mxu0 }
 0x278   : > { %v2125_v24 = vadd.f32 %v2124_v25, %v4164_v35 }
 0x279   : > { %v2126_v22 = vpop.f32.mrf.mxu0 }
 0x27a   : > { %v2127_v34 = vadd.f32 %v2126_v22, %v4167_v31 }
 0x285   : > { %v2233_v29 = vpop.f32.mrf.mxu1 }
 0x286   : > { %v2234_v37 = vadd.f32 %v2233_v29, %v2121_v42 }
 0x287   : > { %v2235_v16 = vpop.f32.mrf.mxu1 }
 0x288   : > { %2276 = vst [vmem:[%s4186_s11 + $0xc0] sm:$0xff] %v2234_v37  ;;  %v2236_v56 = vadd.f32 %v2235_v16, %v2123_v26 }
 0x289   : > { %v2237_v33 = vpop.f32.mrf.mxu1 }
 0x28a   : > { %2277 = vst [vmem:[%s4186_s11 + $0xc8] sm:$0xff] %v2236_v56  ;;  %v2238_v36 = vadd.f32 %v2237_v33, %v2125_v24 }
 0x28b   : > { %v2239_v9 = vpop.f32.mrf.mxu1 }
 0x28c   : > { %2278 = vst [vmem:[%s4186_s11 + $0xd0] sm:$0xff] %v2238_v36  ;;  %v2240_v50 = vadd.f32 %v2239_v9, %v2127_v34 }
 0x28e   : > { %2279 = vst [vmem:[%s4186_s11 + $0xd8] sm:$0xff] %v2240_v50 }
 0x292   : > { %v2130_v38 = vpop.f32.mrf.mxu0 }
 0x293   : > { %v2131_v45 = vadd.f32 %v2130_v38, %v4164_v35 }
 0x294   : > { %v2132_v43 = vpop.f32.mrf.mxu0 }
 0x295   : > { %v2133_v30 = vadd.f32 %v2132_v43, %v4167_v31 }
 0x296   : > { %v2134_v19 = vpop.f32.mrf.mxu0 }
 0x297   : > { %v2135_v62 = vadd.f32 %v2134_v19, %v4164_v35 }
 0x298   : > { %v2136_v39 = vpop.f32.mrf.mxu0 }
 0x299   : > { %v2137_v48 = vadd.f32 %v2136_v39, %v4167_v31 }
 0x2a4   : > { %v2243_v46 = vpop.f32.mrf.mxu1 }
 0x2a5   : > { %v2244_v17 = vadd.f32 %v2243_v46, %v2131_v45 }
 0x2a6   : > { %v2245_v40 = vpop.f32.mrf.mxu1 }
 0x2a7   : > { %2280 = vst [vmem:[%s4186_s11 + $0xe0] sm:$0xff] %v2244_v17  ;;  %v2246_v57 = vadd.f32 %v2245_v40, %v2133_v30 }
 0x2a8   : > { %v2247_v59 = vpop.f32.mrf.mxu1 }
 0x2a9   : > { %2281 = vst [vmem:[%s4186_s11 + $0xe8] sm:$0xff] %v2246_v57  ;;  %v2248_v28 = vadd.f32 %v2247_v59, %v2135_v62 }
 0x2aa   : > { %v2249_v61 = vpop.f32.mrf.mxu1 }
 0x2ab   : > { %2282 = vst [vmem:[%s4186_s11 + $0xf0] sm:$0xff] %v2248_v28  ;;  %v2250_v35 = vadd.f32 %v2249_v61, %v2137_v48 }
 0x2ad   : > { %2283 = vst [vmem:[%s4186_s11 + $0xf8] sm:$0xff] %v2250_v35 }
 0x2ae   : > { %3368 = shalt.err (!%p3365_p4)
}
 0x2af   : > { %s3369_s26 = scalar_lea.hbm %s4275_s14, 4096  ;;  %s3373_s15 = scalar_lea.hbm %s4327_s5, 8192 }
 0x2b0   : > { %p3370_p0 = scmp.ne.s32.totalorder %s4275_s14, %s3369_s26  ;;  %p3374_p11 = scmp.lt.s32.totalorder %s4275_s14, %s4327_s5 }
 0x2b1   : > { %p3375_p8 = scmp.lt.s32.totalorder %s3373_s15, %s3369_s26 }
 0x2b2   : > { %p3371_p7 = pnand %p3370_p0, %p4347_p13 }
 0x2b3   : > { %p3376_p9 = por %p3375_p8, %p3374_p11 }
 0x2b4   : > { %p3372_p6 = pneg %p3371_p7 }
 0x2b6   : > { %p3377_p12 = pnand %p3376_p9, %p3372_p6 }
 0x2b8   : > { %3380 = shalt.err (!%p3377_p12)
}
 0x2b9   : > { %s3442_s28 = smov 256   ;;  %s3443_s11 = smov 16  }
 0x2ba   : > { %2588 = dma.vmem_to_hbm [thread:$0]  (%p4347_p13), %s4277_s27, 4096, %s4275_s14, %s2285_s10, %s3442_s28, %s3442_s28, %s3443_s11  }
 0x2bb PF: > { %s2314_s29 = sand.u32 1, %s3419_s18   ;;  %p4348_p3 = scmp.ne.s32.totalorder %s4334_s25, 0 }
 0x2bc   : > { %p4349_p5 = scmp.ge.s32.totalorder %s3431_s21, 2  ;;  %s2315_s6 = scalar_lea.sflag [#allocation4], %s2314_s29 }
 0x2be   : > { %p2605_p2 = pnand %p4349_p5, %p4348_p3 }
 0x2c0   : > { %p2606_p10 = pneg %p2605_p2 }
 0x2c2   : > { %3414 = dma.done.wait (%p2606_p10), %s2315_s6, 4096  }
 0x2c3   : > { %3416 = vsyncadd (%p2606_p10), %s2315_s6, 4294963200  ;;  %p22_p1 = scmp.ge.s32.totalorder %s3528_s30, 4   ;;  %s4350_s18 = smov %s3423_s19 }
 0x2c4   : > { %s4351_s19 = smov %s3427_s20  ;;  %s4352_s20 = smov %s3549_s16 }
 0x2c5   : > { %s4353_s21 = smov %s3528_s30  ;;  %24 = sbr.rel (!%p22_p1) target bundleno = 11 (0xb), region = 107 }
 0x2ca   :  { %2320 = vsyncpa [#allocation3], 1 }
 0x2cb   :  { %2322 = vsyncpa [#allocation3 + $0x1], 1 }
 0x2cc   :  { %2323 = vsyncpa [#allocation8], 1 }
 0x2cd   :  { %2325 = vsyncpa [#allocation8 + $0x1], 1 }
 0x2ce   :  { %2326 = vsyncpa [#allocation4], 1 }
 0x2cf   :  { %2328 = vsyncpa [#allocation4 + $0x1], 1 }
 0x2d0   :  { %2329 = vsyncpa [#allocation5], 1 }
 0x2d1   :  { %2331 = vsyncpa [#allocation5 + $0x1], 1 }

</bundles_post_ra>
